<compile_context>
chip_gen: v7x
topology: tpu7x:2x2x1
jax: 0.10.0
libtpu: 0.0.40
codegen_flags: <defaults>
</compile_context>

<pallas_src>
import functools

import jax
import jax.numpy as jnp
from jax.experimental import pallas as pl
from jax.experimental.pallas import tpu as pltpu

EPS = 1e-5                              # nn.BatchNorm3d default eps
VMEM_LIMIT_BYTES = 32 * 1024 * 1024     # safe on v5e/v6e (128 MiB) and v7x (64 MiB/TC)


# ----------------------------------------------------------------------------
# Pass A: one output depth slice = 3x3x3 conv (taps built in VMEM from three
# halo'd depth slabs, 27 accumulated MXU matmuls) + per-tile BN partials.
# ----------------------------------------------------------------------------
def conv_stats_kernel(xd0_ref, xd1_ref, xd2_ref, w_ref, y_ref, stats_ref, *, H, W, cin):
    # xd{k}_ref : [1, 1, Hp, Wp, Cin]   padded depth slice d+k   (mxu dtype)
    # w_ref     : [27*Cin, Cout]        (mxu dtype), K order = (kd, kh, kw, cin)
    # y_ref     : [1, 1, H*W, Cout]     conv output tile (mxu dtype)
    # stats_ref : [1, 1, 8, Cout]       row 0 = sum, row 1 = sum of squares (f32)
    slabs = (xd0_ref, xd1_ref, xd2_ref)
    hw = H * W
    cout = w_ref.shape[1]
    acc = jnp.zeros((hw, cout), jnp.float32)
    for kd in range(3):
        for kh in range(3):
            for kw in range(3):
                tap = slabs[kd][0, 0, kh:kh + H, kw:kw + W, :].reshape(hw, cin)
                k0 = (kd * 9 + kh * 3 + kw) * cin
                acc = acc + jnp.dot(tap, w_ref[k0:k0 + cin, :],
                                    preferred_element_type=jnp.float32)
    y_ref[0, 0] = acc.astype(y_ref.dtype)

    s = jnp.sum(acc, axis=0, keepdims=True)           # [1, Cout]
    ss = jnp.sum(acc * acc, axis=0, keepdims=True)    # [1, Cout]
    rows = jax.lax.broadcasted_iota(jnp.int32, stats_ref.shape, 2)
    stats_ref[...] = jnp.where(rows == 0, s, jnp.where(rows == 1, ss, 0.0))


# ----------------------------------------------------------------------------
# Pass B: normalize (+ residual) + ReLU, per (n, d) tile
# ----------------------------------------------------------------------------
def bn_relu_kernel(y_ref, p_ref, o_ref):
    scale = p_ref[0:1, :]
    shift = p_ref[1:2, :]
    y = y_ref[...].astype(jnp.float32)
    o_ref[...] = jnp.maximum(y * scale + shift, 0.0).astype(o_ref.dtype)


def bn_add_relu_kernel(y_ref, p_ref, r_ref, o_ref):
    scale = p_ref[0:1, :]
    shift = p_ref[1:2, :]
    y = y_ref[...].astype(jnp.float32)
    r = r_ref[...].astype(jnp.float32)
    o_ref[...] = jnp.maximum(y * scale + shift + r, 0.0).astype(o_ref.dtype)


# ----------------------------------------------------------------------------
# One conv -> BN(batch stats) -> (+residual) -> ReLU stage
# ----------------------------------------------------------------------------
def _conv_bn_relu_stage(x_pad, w_mat, gamma, beta, residual, out_dtype):
    # x_pad   : [N, D+2, H+2, W+2, Cin]   (mxu dtype, zero halo)
    # w_mat   : [27*Cin, Cout]            (mxu dtype)
    # residual: None or [N, D, H*W, Cout] (mxu dtype)
    n, dp2, hp, wp, cin = x_pad.shape
    d, h, w = dp2 - 2, hp - 2, wp - 2
    hw = h * w
    cout = w_mat.shape[1]
    m_true = n * d * hw

    cparams = pltpu.CompilerParams(
        dimension_semantics=("parallel", "parallel"),
        vmem_limit_bytes=VMEM_LIMIT_BYTES)

    def slab_spec(shift):
        return pl.BlockSpec((1, 1, hp, wp, cin),
                            lambda ni, di, s=shift: (ni, di + s, 0, 0, 0))

    # ---- pass A: conv + per-tile BN partials ------------------------------
    kern = functools.partial(conv_stats_kernel, H=h, W=w, cin=cin)
    y, stats = pl.pallas_call(
        kern,
        out_shape=(jax.ShapeDtypeStruct((n, d, hw, cout), x_pad.dtype),
                   jax.ShapeDtypeStruct((n, d, 8, cout), jnp.float32)),
        grid=(n, d),
        in_specs=[slab_spec(0), slab_spec(1), slab_spec(2),
                  pl.BlockSpec((27 * cin, cout), lambda ni, di: (0, 0))],
        out_specs=(pl.BlockSpec((1, 1, hw, cout), lambda ni, di: (ni, di, 0, 0)),
                   pl.BlockSpec((1, 1, 8, cout), lambda ni, di: (ni, di, 0, 0))),
        compiler_params=cparams,
    )(x_pad, x_pad, x_pad, w_mat)

    # ---- tiny XLA reduction of partials -> per-channel scale / shift ------
    csum = jnp.sum(stats[:, :, 0, :], axis=(0, 1))
    csumsq = jnp.sum(stats[:, :, 1, :], axis=(0, 1))
    mean = csum / m_true
    var = jnp.maximum(csumsq / m_true - mean * mean, 0.0)
    inv = jax.lax.rsqrt(var + EPS)
    scale = gamma.astype(jnp.float32) * inv
    shift = beta.astype(jnp.float32) - mean * scale
    p8 = jnp.zeros((8, cout), jnp.float32).at[0].set(scale).at[1].set(shift)

    # ---- pass B: normalize (+ residual) + ReLU ----------------------------
    tile = pl.BlockSpec((1, 1, hw, cout), lambda ni, di: (ni, di, 0, 0))
    pspec = pl.BlockSpec((8, cout), lambda ni, di: (0, 0))
    if residual is None:
        out = pl.pallas_call(
            bn_relu_kernel,
            out_shape=jax.ShapeDtypeStruct((n, d, hw, cout), out_dtype),
            grid=(n, d),
            in_specs=[tile, pspec],
            out_specs=tile,
            compiler_params=cparams,
        )(y, p8)
    else:
        out = pl.pallas_call(
            bn_add_relu_kernel,
            out_shape=jax.ShapeDtypeStruct((n, d, hw, cout), out_dtype),
            grid=(n, d),
            in_specs=[tile, pspec, tile],
            out_specs=tile,
            compiler_params=cparams,
        )(y, p8, residual)
    return out   # [n, d, h*w, cout]


# ----------------------------------------------------------------------------
# Plain-JAX glue: layout, halo pad, weight reshaping
# ----------------------------------------------------------------------------
def _conv_weight_to_mat(w_oidhw):
    """[Cout, Cin, 3, 3, 3] -> [27*Cin, Cout] with K order (kd, kh, kw, cin)."""
    cout, cin = w_oidhw.shape[:2]
    return jnp.transpose(w_oidhw, (2, 3, 4, 1, 0)).reshape(27 * cin, cout)


def _expand_grouped(w, groups):
    """Grouped weight [Cout, Cin/g, k,k,k] -> dense block-diagonal [Cout, Cin, k,k,k]."""
    cout, cin_g = w.shape[:2]
    cin = cin_g * groups
    cout_g = cout // groups
    wd = jnp.zeros((cout, cin) + w.shape[2:], w.dtype)
    for g in range(groups):
        wd = wd.at[g * cout_g:(g + 1) * cout_g,
                   g * cin_g:(g + 1) * cin_g].set(w[g * cout_g:(g + 1) * cout_g])
    return wd


@functools.partial(jax.jit, static_argnames=("cardinality", "use_bf16"))
def resnext_basic_block(x_ncdhw, params, cardinality, use_bf16=True):
    """Forward pass of ResNeXtBasicBlock (stride=1, downsample=None)."""
    n, c, d, h, w = x_ncdhw.shape
    planes = params["w1"].shape[0]
    assert planes == c, "identity residual requires inplanes == planes"
    mxu_dtype = jnp.bfloat16 if use_bf16 else jnp.float32
    halo = ((0, 0), (1, 1), (1, 1), (1, 1), (0, 0))

    x_t = jnp.transpose(x_ncdhw, (0, 2, 3, 4, 1)).astype(mxu_dtype)    # NDHWC

    w1 = _conv_weight_to_mat(params["w1"]).astype(mxu_dtype)
    w2 = _conv_weight_to_mat(_expand_grouped(params["w2"], cardinality)).astype(mxu_dtype)

    # stage 1: conv1 -> bn1 -> relu  (no residual); emitted in MXU dtype
    y1 = _conv_bn_relu_stage(jnp.pad(x_t, halo), w1, params["g1"], params["b1"],
                             residual=None, out_dtype=mxu_dtype)       # [n,d,h*w,planes]

    # stage 2: conv2(grouped) -> bn2 -> +x -> relu; f32 output
    x2_pad = jnp.pad(y1.reshape(n, d, h, w, planes), halo)
    res = x_t.reshape(n, d, h * w, c)
    y2 = _conv_bn_relu_stage(x2_pad, w2, params["g2"], params["b2"],
                             residual=res, out_dtype=jnp.float32)      # [n,d,h*w,planes]

    out = y2.reshape(n, d, h, w, planes)
    return jnp.transpose(out, (0, 4, 1, 2, 3))


# ----------------------------------------------------------------------------
# Pure-JAX reference (mirrors the PyTorch forward with training-mode BN)
# ----------------------------------------------------------------------------
def _bn_train_ref(y, gamma, beta):
    mean = jnp.mean(y, axis=(0, 2, 3, 4), keepdims=True)
    var = jnp.mean(jnp.square(y - mean), axis=(0, 2, 3, 4), keepdims=True)
    return ((y - mean) * jax.lax.rsqrt(var + EPS)
            * gamma.reshape(1, -1, 1, 1, 1) + beta.reshape(1, -1, 1, 1, 1))


def resnext_basic_block_ref(x, params, cardinality):
    dn = ("NCDHW", "OIDHW", "NCDHW")
    hp = jax.lax.Precision.HIGHEST
    out = jax.lax.conv_general_dilated(
        x, params["w1"], (1, 1, 1), [(1, 1)] * 3, dimension_numbers=dn, precision=hp)
    out = jnp.maximum(_bn_train_ref(out, params["g1"], params["b1"]), 0.0)
    out = jax.lax.conv_general_dilated(
        out, params["w2"], (1, 1, 1), [(1, 1)] * 3, dimension_numbers=dn,
        feature_group_count=cardinality, precision=hp)
    out = _bn_train_ref(out, params["g2"], params["b2"]) + x
    return jnp.maximum(out, 0.0)


# ----------------------------------------------------------------------------
if __name__ == "__main__":
    key = jax.random.PRNGKey(0)
    ks = jax.random.split(key, 7)

    # small shapes consistent with the module (Conv3d -> NCDHW input)
    n, inplanes, d, h, w = 2, 8, 8, 8, 8
    planes, cardinality = 8, 4   # inplanes == planes, stride=1, downsample=None

    x = jax.random.normal(ks[0], (n, inplanes, d, h, w), jnp.float32)
    params = {
        "w1": 0.1 * jax.random.normal(ks[1], (planes, inplanes, 3, 3, 3), jnp.float32),
        "g1": 1.0 + 0.1 * jax.random.normal(ks[2], (planes,), jnp.float32),
        "b1": 0.1 * jax.random.normal(ks[3], (planes,), jnp.float32),
        "w2": 0.1 * jax.random.normal(
            ks[4], (planes, planes // cardinality, 3, 3, 3), jnp.float32),
        "g2": 1.0 + 0.1 * jax.random.normal(ks[5], (planes,), jnp.float32),
        "b2": 0.1 * jax.random.normal(ks[6], (planes,), jnp.float32),
    }

    ref = resnext_basic_block_ref(x, params, cardinality)

    # f32 MXU path: tight correctness check (f32 intermediates end to end).
    out_f32 = jax.block_until_ready(
        resnext_basic_block(x, params, cardinality=cardinality, use_bf16=False))
    assert out_f32.shape == x.shape
    err_f32 = float(jnp.max(jnp.abs(out_f32 - ref)))
    assert err_f32 < 2e-2, f"f32 path max abs err {err_f32}"

    # bf16 MXU path (default / fast): bf16 operands + bf16 intermediates,
    # f32 accumulation and f32 BN math.
    out_bf16 = jax.block_until_ready(
        resnext_basic_block(x, params, cardinality=cardinality, use_bf16=True))
    assert out_bf16.shape == x.shape
    err_bf16 = float(jnp.max(jnp.abs(out_bf16 - ref)))
    mae_bf16 = float(jnp.mean(jnp.abs(out_bf16 - ref)))
    assert err_bf16 < 2.5e-1 and mae_bf16 < 3e-2, \
        f"bf16 path errs: max={err_bf16}, mean={mae_bf16}"

    print("KERNEL_OK")
</pallas_src>

<mosaic_0001>
module attributes {stable_mosaic.version = 11 : i64} {
  func.func @conv_stats_kernel(%arg0: i32, %arg1: i32, %arg2: memref<1x1x10x10x8xf32, #tpu.memory_space<vmem>>, %arg3: memref<1x1x10x10x8xf32, #tpu.memory_space<vmem>>, %arg4: memref<1x1x10x10x8xf32, #tpu.memory_space<vmem>>, %arg5: memref<216x8xf32, #tpu.memory_space<vmem>>, %arg6: memref<1x1x64x8xf32, #tpu.memory_space<vmem>>, %arg7: memref<1x1x8x8xf32, #tpu.memory_space<vmem>>) attributes {dimension_semantics = [#tpu.dimension_semantics<parallel>, #tpu.dimension_semantics<parallel>], iteration_bounds = array<i64: 2, 8>, scalar_prefetch = 0 : i64, scratch_operands = 0 : i64, tpu.core_type = #tpu.core_type<tc>, window_params = [{transform_indices = @transform_0, window_bounds = array<i64: 1, 1, 10, 10, 8>}, {transform_indices = @transform_1, window_bounds = array<i64: 1, 1, 10, 10, 8>}, {transform_indices = @transform_2, window_bounds = array<i64: 1, 1, 10, 10, 8>}, {pipeline_mode = #tpu.pipeline_mode<synchronous>, transform_indices = @transform_3, window_bounds = array<i64: 216, 8>}, {transform_indices = @transform_4, window_bounds = array<i64: 1, 1, 64, 8>}, {transform_indices = @transform_5, window_bounds = array<i64: 1, 1, 8, 8>}]} {
    %cst = arith.constant 0.000000e+00 : f32
    %0 = vector.broadcast %cst : f32 to vector<64x8xf32>
    %c0 = arith.constant 0 : index
    %c0_0 = arith.constant 0 : index
    %c0_1 = arith.constant 0 : index
    %c0_2 = arith.constant 0 : index
    %c0_3 = arith.constant 0 : index
    %1 = vector.load %arg2[%c0, %c0_0, %c0_1, %c0_2, %c0_3] : memref<1x1x10x10x8xf32, #tpu.memory_space<vmem>>, vector<1x1x8x8x8xf32>
    %2 = vector.shape_cast %1 : vector<1x1x8x8x8xf32> to vector<8x8x8xf32>
    %3 = vector.shape_cast %2 : vector<8x8x8xf32> to vector<64x8xf32>
    %c0_4 = arith.constant 0 : index
    %c0_5 = arith.constant 0 : index
    %4 = vector.load %arg5[%c0_4, %c0_5] : memref<216x8xf32, #tpu.memory_space<vmem>>, vector<8x8xf32>
    %cst_6 = arith.constant dense<0.000000e+00> : vector<64x8xf32>
    %5 = tpu.matmul %3, %4, %cst_6 {dimension_numbers = #tpu.dot_dimension_numbers<[1], [0], [0], [1], [0, 0, 1, 1], [], []>} : vector<64x8xf32>, vector<8x8xf32>, vector<64x8xf32> -> vector<64x8xf32>
    %6 = arith.addf %0, %5 : vector<64x8xf32>
    %c0_7 = arith.constant 0 : index
    %c0_8 = arith.constant 0 : index
    %c0_9 = arith.constant 0 : index
    %c1 = arith.constant 1 : index
    %c0_10 = arith.constant 0 : index
    %7 = vector.load %arg2[%c0_7, %c0_8, %c0_9, %c1, %c0_10] : memref<1x1x10x10x8xf32, #tpu.memory_space<vmem>>, vector<1x1x8x8x8xf32>
    %8 = vector.shape_cast %7 : vector<1x1x8x8x8xf32> to vector<8x8x8xf32>
    %9 = vector.shape_cast %8 : vector<8x8x8xf32> to vector<64x8xf32>
    %c8 = arith.constant 8 : index
    %c0_11 = arith.constant 0 : index
    %10 = vector.load %arg5[%c8, %c0_11] : memref<216x8xf32, #tpu.memory_space<vmem>>, vector<8x8xf32>
    %cst_12 = arith.constant dense<0.000000e+00> : vector<64x8xf32>
    %11 = tpu.matmul %9, %10, %cst_12 {dimension_numbers = #tpu.dot_dimension_numbers<[1], [0], [0], [1], [0, 0, 1, 1], [], []>} : vector<64x8xf32>, vector<8x8xf32>, vector<64x8xf32> -> vector<64x8xf32>
    %12 = arith.addf %6, %11 : vector<64x8xf32>
    %c0_13 = arith.constant 0 : index
    %c0_14 = arith.constant 0 : index
    %c0_15 = arith.constant 0 : index
    %c2 = arith.constant 2 : index
    %c0_16 = arith.constant 0 : index
    %13 = vector.load %arg2[%c0_13, %c0_14, %c0_15, %c2, %c0_16] : memref<1x1x10x10x8xf32, #tpu.memory_space<vmem>>, vector<1x1x8x8x8xf32>
    %14 = vector.shape_cast %13 : vector<1x1x8x8x8xf32> to vector<8x8x8xf32>
    %15 = vector.shape_cast %14 : vector<8x8x8xf32> to vector<64x8xf32>
    %c16 = arith.constant 16 : index
    %c0_17 = arith.constant 0 : index
    %16 = vector.load %arg5[%c16, %c0_17] : memref<216x8xf32, #tpu.memory_space<vmem>>, vector<8x8xf32>
    %cst_18 = arith.constant dense<0.000000e+00> : vector<64x8xf32>
    %17 = tpu.matmul %15, %16, %cst_18 {dimension_numbers = #tpu.dot_dimension_numbers<[1], [0], [0], [1], [0, 0, 1, 1], [], []>} : vector<64x8xf32>, vector<8x8xf32>, vector<64x8xf32> -> vector<64x8xf32>
    %18 = arith.addf %12, %17 : vector<64x8xf32>
    %c0_19 = arith.constant 0 : index
    %c0_20 = arith.constant 0 : index
    %c1_21 = arith.constant 1 : index
    %c0_22 = arith.constant 0 : index
    %c0_23 = arith.constant 0 : index
    %19 = vector.load %arg2[%c0_19, %c0_20, %c1_21, %c0_22, %c0_23] : memref<1x1x10x10x8xf32, #tpu.memory_space<vmem>>, vector<1x1x8x8x8xf32>
    %20 = vector.shape_cast %19 : vector<1x1x8x8x8xf32> to vector<8x8x8xf32>
    %21 = vector.shape_cast %20 : vector<8x8x8xf32> to vector<64x8xf32>
    %c24 = arith.constant 24 : index
    %c0_24 = arith.constant 0 : index
    %22 = vector.load %arg5[%c24, %c0_24] : memref<216x8xf32, #tpu.memory_space<vmem>>, vector<8x8xf32>
    %cst_25 = arith.constant dense<0.000000e+00> : vector<64x8xf32>
    %23 = tpu.matmul %21, %22, %cst_25 {dimension_numbers = #tpu.dot_dimension_numbers<[1], [0], [0], [1], [0, 0, 1, 1], [], []>} : vector<64x8xf32>, vector<8x8xf32>, vector<64x8xf32> -> vector<64x8xf32>
    %24 = arith.addf %18, %23 : vector<64x8xf32>
    %c0_26 = arith.constant 0 : index
    %c0_27 = arith.constant 0 : index
    %c1_28 = arith.constant 1 : index
    %c1_29 = arith.constant 1 : index
    %c0_30 = arith.constant 0 : index
    %25 = vector.load %arg2[%c0_26, %c0_27, %c1_28, %c1_29, %c0_30] : memref<1x1x10x10x8xf32, #tpu.memory_space<vmem>>, vector<1x1x8x8x8xf32>
    %26 = vector.shape_cast %25 : vector<1x1x8x8x8xf32> to vector<8x8x8xf32>
    %27 = vector.shape_cast %26 : vector<8x8x8xf32> to vector<64x8xf32>
    %c32 = arith.constant 32 : index
    %c0_31 = arith.constant 0 : index
    %28 = vector.load %arg5[%c32, %c0_31] : memref<216x8xf32, #tpu.memory_space<vmem>>, vector<8x8xf32>
    %cst_32 = arith.constant dense<0.000000e+00> : vector<64x8xf32>
    %29 = tpu.matmul %27, %28, %cst_32 {dimension_numbers = #tpu.dot_dimension_numbers<[1], [0], [0], [1], [0, 0, 1, 1], [], []>} : vector<64x8xf32>, vector<8x8xf32>, vector<64x8xf32> -> vector<64x8xf32>
    %30 = arith.addf %24, %29 : vector<64x8xf32>
    %c0_33 = arith.constant 0 : index
    %c0_34 = arith.constant 0 : index
    %c1_35 = arith.constant 1 : index
    %c2_36 = arith.constant 2 : index
    %c0_37 = arith.constant 0 : index
    %31 = vector.load %arg2[%c0_33, %c0_34, %c1_35, %c2_36, %c0_37] : memref<1x1x10x10x8xf32, #tpu.memory_space<vmem>>, vector<1x1x8x8x8xf32>
    %32 = vector.shape_cast %31 : vector<1x1x8x8x8xf32> to vector<8x8x8xf32>
    %33 = vector.shape_cast %32 : vector<8x8x8xf32> to vector<64x8xf32>
    %c40 = arith.constant 40 : index
    %c0_38 = arith.constant 0 : index
    %34 = vector.load %arg5[%c40, %c0_38] : memref<216x8xf32, #tpu.memory_space<vmem>>, vector<8x8xf32>
    %cst_39 = arith.constant dense<0.000000e+00> : vector<64x8xf32>
    %35 = tpu.matmul %33, %34, %cst_39 {dimension_numbers = #tpu.dot_dimension_numbers<[1], [0], [0], [1], [0, 0, 1, 1], [], []>} : vector<64x8xf32>, vector<8x8xf32>, vector<64x8xf32> -> vector<64x8xf32>
    %36 = arith.addf %30, %35 : vector<64x8xf32>
    %c0_40 = arith.constant 0 : index
    %c0_41 = arith.constant 0 : index
    %c2_42 = arith.constant 2 : index
    %c0_43 = arith.constant 0 : index
    %c0_44 = arith.constant 0 : index
    %37 = vector.load %arg2[%c0_40, %c0_41, %c2_42, %c0_43, %c0_44] : memref<1x1x10x10x8xf32, #tpu.memory_space<vmem>>, vector<1x1x8x8x8xf32>
    %38 = vector.shape_cast %37 : vector<1x1x8x8x8xf32> to vector<8x8x8xf32>
    %39 = vector.shape_cast %38 : vector<8x8x8xf32> to vector<64x8xf32>
    %c48 = arith.constant 48 : index
    %c0_45 = arith.constant 0 : index
    %40 = vector.load %arg5[%c48, %c0_45] : memref<216x8xf32, #tpu.memory_space<vmem>>, vector<8x8xf32>
    %cst_46 = arith.constant dense<0.000000e+00> : vector<64x8xf32>
    %41 = tpu.matmul %39, %40, %cst_46 {dimension_numbers = #tpu.dot_dimension_numbers<[1], [0], [0], [1], [0, 0, 1, 1], [], []>} : vector<64x8xf32>, vector<8x8xf32>, vector<64x8xf32> -> vector<64x8xf32>
    %42 = arith.addf %36, %41 : vector<64x8xf32>
    %c0_47 = arith.constant 0 : index
    %c0_48 = arith.constant 0 : index
    %c2_49 = arith.constant 2 : index
    %c1_50 = arith.constant 1 : index
    %c0_51 = arith.constant 0 : index
    %43 = vector.load %arg2[%c0_47, %c0_48, %c2_49, %c1_50, %c0_51] : memref<1x1x10x10x8xf32, #tpu.memory_space<vmem>>, vector<1x1x8x8x8xf32>
    %44 = vector.shape_cast %43 : vector<1x1x8x8x8xf32> to vector<8x8x8xf32>
    %45 = vector.shape_cast %44 : vector<8x8x8xf32> to vector<64x8xf32>
    %c56 = arith.constant 56 : index
    %c0_52 = arith.constant 0 : index
    %46 = vector.load %arg5[%c56, %c0_52] : memref<216x8xf32, #tpu.memory_space<vmem>>, vector<8x8xf32>
    %cst_53 = arith.constant dense<0.000000e+00> : vector<64x8xf32>
    %47 = tpu.matmul %45, %46, %cst_53 {dimension_numbers = #tpu.dot_dimension_numbers<[1], [0], [0], [1], [0, 0, 1, 1], [], []>} : vector<64x8xf32>, vector<8x8xf32>, vector<64x8xf32> -> vector<64x8xf32>
    %48 = arith.addf %42, %47 : vector<64x8xf32>
    %c0_54 = arith.constant 0 : index
    %c0_55 = arith.constant 0 : index
    %c2_56 = arith.constant 2 : index
    %c2_57 = arith.constant 2 : index
    %c0_58 = arith.constant 0 : index
    %49 = vector.load %arg2[%c0_54, %c0_55, %c2_56, %c2_57, %c0_58] : memref<1x1x10x10x8xf32, #tpu.memory_space<vmem>>, vector<1x1x8x8x8xf32>
    %50 = vector.shape_cast %49 : vector<1x1x8x8x8xf32> to vector<8x8x8xf32>
    %51 = vector.shape_cast %50 : vector<8x8x8xf32> to vector<64x8xf32>
    %c64 = arith.constant 64 : index
    %c0_59 = arith.constant 0 : index
    %52 = vector.load %arg5[%c64, %c0_59] : memref<216x8xf32, #tpu.memory_space<vmem>>, vector<8x8xf32>
    %cst_60 = arith.constant dense<0.000000e+00> : vector<64x8xf32>
    %53 = tpu.matmul %51, %52, %cst_60 {dimension_numbers = #tpu.dot_dimension_numbers<[1], [0], [0], [1], [0, 0, 1, 1], [], []>} : vector<64x8xf32>, vector<8x8xf32>, vector<64x8xf32> -> vector<64x8xf32>
    %54 = arith.addf %48, %53 : vector<64x8xf32>
    %c0_61 = arith.constant 0 : index
    %c0_62 = arith.constant 0 : index
    %c0_63 = arith.constant 0 : index
    %c0_64 = arith.constant 0 : index
    %c0_65 = arith.constant 0 : index
    %55 = vector.load %arg3[%c0_61, %c0_62, %c0_63, %c0_64, %c0_65] : memref<1x1x10x10x8xf32, #tpu.memory_space<vmem>>, vector<1x1x8x8x8xf32>
    %56 = vector.shape_cast %55 : vector<1x1x8x8x8xf32> to vector<8x8x8xf32>
    %57 = vector.shape_cast %56 : vector<8x8x8xf32> to vector<64x8xf32>
    %c72 = arith.constant 72 : index
    %c0_66 = arith.constant 0 : index
    %58 = vector.load %arg5[%c72, %c0_66] : memref<216x8xf32, #tpu.memory_space<vmem>>, vector<8x8xf32>
    %cst_67 = arith.constant dense<0.000000e+00> : vector<64x8xf32>
    %59 = tpu.matmul %57, %58, %cst_67 {dimension_numbers = #tpu.dot_dimension_numbers<[1], [0], [0], [1], [0, 0, 1, 1], [], []>} : vector<64x8xf32>, vector<8x8xf32>, vector<64x8xf32> -> vector<64x8xf32>
    %60 = arith.addf %54, %59 : vector<64x8xf32>
    %c0_68 = arith.constant 0 : index
    %c0_69 = arith.constant 0 : index
    %c0_70 = arith.constant 0 : index
    %c1_71 = arith.constant 1 : index
    %c0_72 = arith.constant 0 : index
    %61 = vector.load %arg3[%c0_68, %c0_69, %c0_70, %c1_71, %c0_72] : memref<1x1x10x10x8xf32, #tpu.memory_space<vmem>>, vector<1x1x8x8x8xf32>
    %62 = vector.shape_cast %61 : vector<1x1x8x8x8xf32> to vector<8x8x8xf32>
    %63 = vector.shape_cast %62 : vector<8x8x8xf32> to vector<64x8xf32>
    %c80 = arith.constant 80 : index
    %c0_73 = arith.constant 0 : index
    %64 = vector.load %arg5[%c80, %c0_73] : memref<216x8xf32, #tpu.memory_space<vmem>>, vector<8x8xf32>
    %cst_74 = arith.constant dense<0.000000e+00> : vector<64x8xf32>
    %65 = tpu.matmul %63, %64, %cst_74 {dimension_numbers = #tpu.dot_dimension_numbers<[1], [0], [0], [1], [0, 0, 1, 1], [], []>} : vector<64x8xf32>, vector<8x8xf32>, vector<64x8xf32> -> vector<64x8xf32>
    %66 = arith.addf %60, %65 : vector<64x8xf32>
    %c0_75 = arith.constant 0 : index
    %c0_76 = arith.constant 0 : index
    %c0_77 = arith.constant 0 : index
    %c2_78 = arith.constant 2 : index
    %c0_79 = arith.constant 0 : index
    %67 = vector.load %arg3[%c0_75, %c0_76, %c0_77, %c2_78, %c0_79] : memref<1x1x10x10x8xf32, #tpu.memory_space<vmem>>, vector<1x1x8x8x8xf32>
    %68 = vector.shape_cast %67 : vector<1x1x8x8x8xf32> to vector<8x8x8xf32>
    %69 = vector.shape_cast %68 : vector<8x8x8xf32> to vector<64x8xf32>
    %c88 = arith.constant 88 : index
    %c0_80 = arith.constant 0 : index
    %70 = vector.load %arg5[%c88, %c0_80] : memref<216x8xf32, #tpu.memory_space<vmem>>, vector<8x8xf32>
    %cst_81 = arith.constant dense<0.000000e+00> : vector<64x8xf32>
    %71 = tpu.matmul %69, %70, %cst_81 {dimension_numbers = #tpu.dot_dimension_numbers<[1], [0], [0], [1], [0, 0, 1, 1], [], []>} : vector<64x8xf32>, vector<8x8xf32>, vector<64x8xf32> -> vector<64x8xf32>
    %72 = arith.addf %66, %71 : vector<64x8xf32>
    %c0_82 = arith.constant 0 : index
    %c0_83 = arith.constant 0 : index
    %c1_84 = arith.constant 1 : index
    %c0_85 = arith.constant 0 : index
    %c0_86 = arith.constant 0 : index
    %73 = vector.load %arg3[%c0_82, %c0_83, %c1_84, %c0_85, %c0_86] : memref<1x1x10x10x8xf32, #tpu.memory_space<vmem>>, vector<1x1x8x8x8xf32>
    %74 = vector.shape_cast %73 : vector<1x1x8x8x8xf32> to vector<8x8x8xf32>
    %75 = vector.shape_cast %74 : vector<8x8x8xf32> to vector<64x8xf32>
    %c96 = arith.constant 96 : index
    %c0_87 = arith.constant 0 : index
    %76 = vector.load %arg5[%c96, %c0_87] : memref<216x8xf32, #tpu.memory_space<vmem>>, vector<8x8xf32>
    %cst_88 = arith.constant dense<0.000000e+00> : vector<64x8xf32>
    %77 = tpu.matmul %75, %76, %cst_88 {dimension_numbers = #tpu.dot_dimension_numbers<[1], [0], [0], [1], [0, 0, 1, 1], [], []>} : vector<64x8xf32>, vector<8x8xf32>, vector<64x8xf32> -> vector<64x8xf32>
    %78 = arith.addf %72, %77 : vector<64x8xf32>
    %c0_89 = arith.constant 0 : index
    %c0_90 = arith.constant 0 : index
    %c1_91 = arith.constant 1 : index
    %c1_92 = arith.constant 1 : index
    %c0_93 = arith.constant 0 : index
    %79 = vector.load %arg3[%c0_89, %c0_90, %c1_91, %c1_92, %c0_93] : memref<1x1x10x10x8xf32, #tpu.memory_space<vmem>>, vector<1x1x8x8x8xf32>
    %80 = vector.shape_cast %79 : vector<1x1x8x8x8xf32> to vector<8x8x8xf32>
    %81 = vector.shape_cast %80 : vector<8x8x8xf32> to vector<64x8xf32>
    %c104 = arith.constant 104 : index
    %c0_94 = arith.constant 0 : index
    %82 = vector.load %arg5[%c104, %c0_94] : memref<216x8xf32, #tpu.memory_space<vmem>>, vector<8x8xf32>
    %cst_95 = arith.constant dense<0.000000e+00> : vector<64x8xf32>
    %83 = tpu.matmul %81, %82, %cst_95 {dimension_numbers = #tpu.dot_dimension_numbers<[1], [0], [0], [1], [0, 0, 1, 1], [], []>} : vector<64x8xf32>, vector<8x8xf32>, vector<64x8xf32> -> vector<64x8xf32>
    %84 = arith.addf %78, %83 : vector<64x8xf32>
    %c0_96 = arith.constant 0 : index
    %c0_97 = arith.constant 0 : index
    %c1_98 = arith.constant 1 : index
    %c2_99 = arith.constant 2 : index
    %c0_100 = arith.constant 0 : index
    %85 = vector.load %arg3[%c0_96, %c0_97, %c1_98, %c2_99, %c0_100] : memref<1x1x10x10x8xf32, #tpu.memory_space<vmem>>, vector<1x1x8x8x8xf32>
    %86 = vector.shape_cast %85 : vector<1x1x8x8x8xf32> to vector<8x8x8xf32>
    %87 = vector.shape_cast %86 : vector<8x8x8xf32> to vector<64x8xf32>
    %c112 = arith.constant 112 : index
    %c0_101 = arith.constant 0 : index
    %88 = vector.load %arg5[%c112, %c0_101] : memref<216x8xf32, #tpu.memory_space<vmem>>, vector<8x8xf32>
    %cst_102 = arith.constant dense<0.000000e+00> : vector<64x8xf32>
    %89 = tpu.matmul %87, %88, %cst_102 {dimension_numbers = #tpu.dot_dimension_numbers<[1], [0], [0], [1], [0, 0, 1, 1], [], []>} : vector<64x8xf32>, vector<8x8xf32>, vector<64x8xf32> -> vector<64x8xf32>
    %90 = arith.addf %84, %89 : vector<64x8xf32>
    %c0_103 = arith.constant 0 : index
    %c0_104 = arith.constant 0 : index
    %c2_105 = arith.constant 2 : index
    %c0_106 = arith.constant 0 : index
    %c0_107 = arith.constant 0 : index
    %91 = vector.load %arg3[%c0_103, %c0_104, %c2_105, %c0_106, %c0_107] : memref<1x1x10x10x8xf32, #tpu.memory_space<vmem>>, vector<1x1x8x8x8xf32>
    %92 = vector.shape_cast %91 : vector<1x1x8x8x8xf32> to vector<8x8x8xf32>
    %93 = vector.shape_cast %92 : vector<8x8x8xf32> to vector<64x8xf32>
    %c120 = arith.constant 120 : index
    %c0_108 = arith.constant 0 : index
    %94 = vector.load %arg5[%c120, %c0_108] : memref<216x8xf32, #tpu.memory_space<vmem>>, vector<8x8xf32>
    %cst_109 = arith.constant dense<0.000000e+00> : vector<64x8xf32>
    %95 = tpu.matmul %93, %94, %cst_109 {dimension_numbers = #tpu.dot_dimension_numbers<[1], [0], [0], [1], [0, 0, 1, 1], [], []>} : vector<64x8xf32>, vector<8x8xf32>, vector<64x8xf32> -> vector<64x8xf32>
    %96 = arith.addf %90, %95 : vector<64x8xf32>
    %c0_110 = arith.constant 0 : index
    %c0_111 = arith.constant 0 : index
    %c2_112 = arith.constant 2 : index
    %c1_113 = arith.constant 1 : index
    %c0_114 = arith.constant 0 : index
    %97 = vector.load %arg3[%c0_110, %c0_111, %c2_112, %c1_113, %c0_114] : memref<1x1x10x10x8xf32, #tpu.memory_space<vmem>>, vector<1x1x8x8x8xf32>
    %98 = vector.shape_cast %97 : vector<1x1x8x8x8xf32> to vector<8x8x8xf32>
    %99 = vector.shape_cast %98 : vector<8x8x8xf32> to vector<64x8xf32>
    %c128 = arith.constant 128 : index
    %c0_115 = arith.constant 0 : index
    %100 = vector.load %arg5[%c128, %c0_115] : memref<216x8xf32, #tpu.memory_space<vmem>>, vector<8x8xf32>
    %cst_116 = arith.constant dense<0.000000e+00> : vector<64x8xf32>
    %101 = tpu.matmul %99, %100, %cst_116 {dimension_numbers = #tpu.dot_dimension_numbers<[1], [0], [0], [1], [0, 0, 1, 1], [], []>} : vector<64x8xf32>, vector<8x8xf32>, vector<64x8xf32> -> vector<64x8xf32>
    %102 = arith.addf %96, %101 : vector<64x8xf32>
    %c0_117 = arith.constant 0 : index
    %c0_118 = arith.constant 0 : index
    %c2_119 = arith.constant 2 : index
    %c2_120 = arith.constant 2 : index
    %c0_121 = arith.constant 0 : index
    %103 = vector.load %arg3[%c0_117, %c0_118, %c2_119, %c2_120, %c0_121] : memref<1x1x10x10x8xf32, #tpu.memory_space<vmem>>, vector<1x1x8x8x8xf32>
    %104 = vector.shape_cast %103 : vector<1x1x8x8x8xf32> to vector<8x8x8xf32>
    %105 = vector.shape_cast %104 : vector<8x8x8xf32> to vector<64x8xf32>
    %c136 = arith.constant 136 : index
    %c0_122 = arith.constant 0 : index
    %106 = vector.load %arg5[%c136, %c0_122] : memref<216x8xf32, #tpu.memory_space<vmem>>, vector<8x8xf32>
    %cst_123 = arith.constant dense<0.000000e+00> : vector<64x8xf32>
    %107 = tpu.matmul %105, %106, %cst_123 {dimension_numbers = #tpu.dot_dimension_numbers<[1], [0], [0], [1], [0, 0, 1, 1], [], []>} : vector<64x8xf32>, vector<8x8xf32>, vector<64x8xf32> -> vector<64x8xf32>
    %108 = arith.addf %102, %107 : vector<64x8xf32>
    %c0_124 = arith.constant 0 : index
    %c0_125 = arith.constant 0 : index
    %c0_126 = arith.constant 0 : index
    %c0_127 = arith.constant 0 : index
    %c0_128 = arith.constant 0 : index
    %109 = vector.load %arg4[%c0_124, %c0_125, %c0_126, %c0_127, %c0_128] : memref<1x1x10x10x8xf32, #tpu.memory_space<vmem>>, vector<1x1x8x8x8xf32>
    %110 = vector.shape_cast %109 : vector<1x1x8x8x8xf32> to vector<8x8x8xf32>
    %111 = vector.shape_cast %110 : vector<8x8x8xf32> to vector<64x8xf32>
    %c144 = arith.constant 144 : index
    %c0_129 = arith.constant 0 : index
    %112 = vector.load %arg5[%c144, %c0_129] : memref<216x8xf32, #tpu.memory_space<vmem>>, vector<8x8xf32>
    %cst_130 = arith.constant dense<0.000000e+00> : vector<64x8xf32>
    %113 = tpu.matmul %111, %112, %cst_130 {dimension_numbers = #tpu.dot_dimension_numbers<[1], [0], [0], [1], [0, 0, 1, 1], [], []>} : vector<64x8xf32>, vector<8x8xf32>, vector<64x8xf32> -> vector<64x8xf32>
    %114 = arith.addf %108, %113 : vector<64x8xf32>
    %c0_131 = arith.constant 0 : index
    %c0_132 = arith.constant 0 : index
    %c0_133 = arith.constant 0 : index
    %c1_134 = arith.constant 1 : index
    %c0_135 = arith.constant 0 : index
    %115 = vector.load %arg4[%c0_131, %c0_132, %c0_133, %c1_134, %c0_135] : memref<1x1x10x10x8xf32, #tpu.memory_space<vmem>>, vector<1x1x8x8x8xf32>
    %116 = vector.shape_cast %115 : vector<1x1x8x8x8xf32> to vector<8x8x8xf32>
    %117 = vector.shape_cast %116 : vector<8x8x8xf32> to vector<64x8xf32>
    %c152 = arith.constant 152 : index
    %c0_136 = arith.constant 0 : index
    %118 = vector.load %arg5[%c152, %c0_136] : memref<216x8xf32, #tpu.memory_space<vmem>>, vector<8x8xf32>
    %cst_137 = arith.constant dense<0.000000e+00> : vector<64x8xf32>
    %119 = tpu.matmul %117, %118, %cst_137 {dimension_numbers = #tpu.dot_dimension_numbers<[1], [0], [0], [1], [0, 0, 1, 1], [], []>} : vector<64x8xf32>, vector<8x8xf32>, vector<64x8xf32> -> vector<64x8xf32>
    %120 = arith.addf %114, %119 : vector<64x8xf32>
    %c0_138 = arith.constant 0 : index
    %c0_139 = arith.constant 0 : index
    %c0_140 = arith.constant 0 : index
    %c2_141 = arith.constant 2 : index
    %c0_142 = arith.constant 0 : index
    %121 = vector.load %arg4[%c0_138, %c0_139, %c0_140, %c2_141, %c0_142] : memref<1x1x10x10x8xf32, #tpu.memory_space<vmem>>, vector<1x1x8x8x8xf32>
    %122 = vector.shape_cast %121 : vector<1x1x8x8x8xf32> to vector<8x8x8xf32>
    %123 = vector.shape_cast %122 : vector<8x8x8xf32> to vector<64x8xf32>
    %c160 = arith.constant 160 : index
    %c0_143 = arith.constant 0 : index
    %124 = vector.load %arg5[%c160, %c0_143] : memref<216x8xf32, #tpu.memory_space<vmem>>, vector<8x8xf32>
    %cst_144 = arith.constant dense<0.000000e+00> : vector<64x8xf32>
    %125 = tpu.matmul %123, %124, %cst_144 {dimension_numbers = #tpu.dot_dimension_numbers<[1], [0], [0], [1], [0, 0, 1, 1], [], []>} : vector<64x8xf32>, vector<8x8xf32>, vector<64x8xf32> -> vector<64x8xf32>
    %126 = arith.addf %120, %125 : vector<64x8xf32>
    %c0_145 = arith.constant 0 : index
    %c0_146 = arith.constant 0 : index
    %c1_147 = arith.constant 1 : index
    %c0_148 = arith.constant 0 : index
    %c0_149 = arith.constant 0 : index
    %127 = vector.load %arg4[%c0_145, %c0_146, %c1_147, %c0_148, %c0_149] : memref<1x1x10x10x8xf32, #tpu.memory_space<vmem>>, vector<1x1x8x8x8xf32>
    %128 = vector.shape_cast %127 : vector<1x1x8x8x8xf32> to vector<8x8x8xf32>
    %129 = vector.shape_cast %128 : vector<8x8x8xf32> to vector<64x8xf32>
    %c168 = arith.constant 168 : index
    %c0_150 = arith.constant 0 : index
    %130 = vector.load %arg5[%c168, %c0_150] : memref<216x8xf32, #tpu.memory_space<vmem>>, vector<8x8xf32>
    %cst_151 = arith.constant dense<0.000000e+00> : vector<64x8xf32>
    %131 = tpu.matmul %129, %130, %cst_151 {dimension_numbers = #tpu.dot_dimension_numbers<[1], [0], [0], [1], [0, 0, 1, 1], [], []>} : vector<64x8xf32>, vector<8x8xf32>, vector<64x8xf32> -> vector<64x8xf32>
    %132 = arith.addf %126, %131 : vector<64x8xf32>
    %c0_152 = arith.constant 0 : index
    %c0_153 = arith.constant 0 : index
    %c1_154 = arith.constant 1 : index
    %c1_155 = arith.constant 1 : index
    %c0_156 = arith.constant 0 : index
    %133 = vector.load %arg4[%c0_152, %c0_153, %c1_154, %c1_155, %c0_156] : memref<1x1x10x10x8xf32, #tpu.memory_space<vmem>>, vector<1x1x8x8x8xf32>
    %134 = vector.shape_cast %133 : vector<1x1x8x8x8xf32> to vector<8x8x8xf32>
    %135 = vector.shape_cast %134 : vector<8x8x8xf32> to vector<64x8xf32>
    %c176 = arith.constant 176 : index
    %c0_157 = arith.constant 0 : index
    %136 = vector.load %arg5[%c176, %c0_157] : memref<216x8xf32, #tpu.memory_space<vmem>>, vector<8x8xf32>
    %cst_158 = arith.constant dense<0.000000e+00> : vector<64x8xf32>
    %137 = tpu.matmul %135, %136, %cst_158 {dimension_numbers = #tpu.dot_dimension_numbers<[1], [0], [0], [1], [0, 0, 1, 1], [], []>} : vector<64x8xf32>, vector<8x8xf32>, vector<64x8xf32> -> vector<64x8xf32>
    %138 = arith.addf %132, %137 : vector<64x8xf32>
    %c0_159 = arith.constant 0 : index
    %c0_160 = arith.constant 0 : index
    %c1_161 = arith.constant 1 : index
    %c2_162 = arith.constant 2 : index
    %c0_163 = arith.constant 0 : index
    %139 = vector.load %arg4[%c0_159, %c0_160, %c1_161, %c2_162, %c0_163] : memref<1x1x10x10x8xf32, #tpu.memory_space<vmem>>, vector<1x1x8x8x8xf32>
    %140 = vector.shape_cast %139 : vector<1x1x8x8x8xf32> to vector<8x8x8xf32>
    %141 = vector.shape_cast %140 : vector<8x8x8xf32> to vector<64x8xf32>
    %c184 = arith.constant 184 : index
    %c0_164 = arith.constant 0 : index
    %142 = vector.load %arg5[%c184, %c0_164] : memref<216x8xf32, #tpu.memory_space<vmem>>, vector<8x8xf32>
    %cst_165 = arith.constant dense<0.000000e+00> : vector<64x8xf32>
    %143 = tpu.matmul %141, %142, %cst_165 {dimension_numbers = #tpu.dot_dimension_numbers<[1], [0], [0], [1], [0, 0, 1, 1], [], []>} : vector<64x8xf32>, vector<8x8xf32>, vector<64x8xf32> -> vector<64x8xf32>
    %144 = arith.addf %138, %143 : vector<64x8xf32>
    %c0_166 = arith.constant 0 : index
    %c0_167 = arith.constant 0 : index
    %c2_168 = arith.constant 2 : index
    %c0_169 = arith.constant 0 : index
    %c0_170 = arith.constant 0 : index
    %145 = vector.load %arg4[%c0_166, %c0_167, %c2_168, %c0_169, %c0_170] : memref<1x1x10x10x8xf32, #tpu.memory_space<vmem>>, vector<1x1x8x8x8xf32>
    %146 = vector.shape_cast %145 : vector<1x1x8x8x8xf32> to vector<8x8x8xf32>
    %147 = vector.shape_cast %146 : vector<8x8x8xf32> to vector<64x8xf32>
    %c192 = arith.constant 192 : index
    %c0_171 = arith.constant 0 : index
    %148 = vector.load %arg5[%c192, %c0_171] : memref<216x8xf32, #tpu.memory_space<vmem>>, vector<8x8xf32>
    %cst_172 = arith.constant dense<0.000000e+00> : vector<64x8xf32>
    %149 = tpu.matmul %147, %148, %cst_172 {dimension_numbers = #tpu.dot_dimension_numbers<[1], [0], [0], [1], [0, 0, 1, 1], [], []>} : vector<64x8xf32>, vector<8x8xf32>, vector<64x8xf32> -> vector<64x8xf32>
    %150 = arith.addf %144, %149 : vector<64x8xf32>
    %c0_173 = arith.constant 0 : index
    %c0_174 = arith.constant 0 : index
    %c2_175 = arith.constant 2 : index
    %c1_176 = arith.constant 1 : index
    %c0_177 = arith.constant 0 : index
    %151 = vector.load %arg4[%c0_173, %c0_174, %c2_175, %c1_176, %c0_177] : memref<1x1x10x10x8xf32, #tpu.memory_space<vmem>>, vector<1x1x8x8x8xf32>
    %152 = vector.shape_cast %151 : vector<1x1x8x8x8xf32> to vector<8x8x8xf32>
    %153 = vector.shape_cast %152 : vector<8x8x8xf32> to vector<64x8xf32>
    %c200 = arith.constant 200 : index
    %c0_178 = arith.constant 0 : index
    %154 = vector.load %arg5[%c200, %c0_178] : memref<216x8xf32, #tpu.memory_space<vmem>>, vector<8x8xf32>
    %cst_179 = arith.constant dense<0.000000e+00> : vector<64x8xf32>
    %155 = tpu.matmul %153, %154, %cst_179 {dimension_numbers = #tpu.dot_dimension_numbers<[1], [0], [0], [1], [0, 0, 1, 1], [], []>} : vector<64x8xf32>, vector<8x8xf32>, vector<64x8xf32> -> vector<64x8xf32>
    %156 = arith.addf %150, %155 : vector<64x8xf32>
    %c0_180 = arith.constant 0 : index
    %c0_181 = arith.constant 0 : index
    %c2_182 = arith.constant 2 : index
    %c2_183 = arith.constant 2 : index
    %c0_184 = arith.constant 0 : index
    %157 = vector.load %arg4[%c0_180, %c0_181, %c2_182, %c2_183, %c0_184] : memref<1x1x10x10x8xf32, #tpu.memory_space<vmem>>, vector<1x1x8x8x8xf32>
    %158 = vector.shape_cast %157 : vector<1x1x8x8x8xf32> to vector<8x8x8xf32>
    %159 = vector.shape_cast %158 : vector<8x8x8xf32> to vector<64x8xf32>
    %c208 = arith.constant 208 : index
    %c0_185 = arith.constant 0 : index
    %160 = vector.load %arg5[%c208, %c0_185] : memref<216x8xf32, #tpu.memory_space<vmem>>, vector<8x8xf32>
    %cst_186 = arith.constant dense<0.000000e+00> : vector<64x8xf32>
    %161 = tpu.matmul %159, %160, %cst_186 {dimension_numbers = #tpu.dot_dimension_numbers<[1], [0], [0], [1], [0, 0, 1, 1], [], []>} : vector<64x8xf32>, vector<8x8xf32>, vector<64x8xf32> -> vector<64x8xf32>
    %162 = arith.addf %156, %161 : vector<64x8xf32>
    %c0_187 = arith.constant 0 : index
    %c0_188 = arith.constant 0 : index
    %c0_189 = arith.constant 0 : index
    %c0_190 = arith.constant 0 : index
    %163 = vector.load %arg6[%c0_187, %c0_188, %c0_189, %c0_190] : memref<1x1x64x8xf32, #tpu.memory_space<vmem>>, vector<1x1x64x8xf32>
    %164 = vector.shape_cast %163 : vector<1x1x64x8xf32> to vector<64x8xf32>
    %165 = vector.shape_cast %162 : vector<64x8xf32> to vector<1x1x64x8xf32>
    tpu.vector_store %arg6[%c0_187, %c0_188, %c0_189, %c0_190], %165 {strides = array<i32>} : memref<1x1x64x8xf32, #tpu.memory_space<vmem>>, vector<1x1x64x8xf32>,
    %cst_191 = arith.constant dense<0.000000e+00> : vector<8xf32>
    %166 = vector.multi_reduction <add>, %162, %cst_191 [0] : vector<64x8xf32> to vector<8xf32>
    %167 = vector.shape_cast %166 : vector<8xf32> to vector<1x8xf32>
    %168 = arith.mulf %162, %162 : vector<64x8xf32>
    %cst_192 = arith.constant dense<0.000000e+00> : vector<8xf32>
    %169 = vector.multi_reduction <add>, %168, %cst_192 [0] : vector<64x8xf32> to vector<8xf32>
    %170 = vector.shape_cast %169 : vector<8xf32> to vector<1x8xf32>
    %171 = tpu.iota {dimensions = array<i32: 2>} : vector<1x1x8x8xi32>
    %c0_i32 = arith.constant 0 : i32
    %172 = vector.broadcast %c0_i32 : i32 to vector<1x1x8x8xi32>
    %173 = arith.cmpi eq, %171, %172 : vector<1x1x8x8xi32>
    %c1_i32 = arith.constant 1 : i32
    %174 = vector.broadcast %c1_i32 : i32 to vector<1x1x8x8xi32>
    %175 = arith.cmpi eq, %171, %174 : vector<1x1x8x8xi32>
    %cst_193 = arith.constant 0.000000e+00 : f32
    %176 = vector.shape_cast %170 : vector<1x8xf32> to vector<1x1x1x8xf32>
    %177 = vector.broadcast %176 : vector<1x1x1x8xf32> to vector<1x1x8x8xf32>
    %178 = vector.broadcast %cst_193 : f32 to vector<1x1x8x8xf32>
    %179 = arith.select %175, %177, %178 : vector<1x1x8x8xi1>, vector<1x1x8x8xf32>
    %180 = vector.shape_cast %167 : vector<1x8xf32> to vector<1x1x1x8xf32>
    %181 = vector.broadcast %180 : vector<1x1x1x8xf32> to vector<1x1x8x8xf32>
    %182 = arith.select %173, %181, %179 : vector<1x1x8x8xi1>, vector<1x1x8x8xf32>
    %c0_194 = arith.constant 0 : index
    %c0_195 = arith.constant 0 : index
    %c0_196 = arith.constant 0 : index
    %c0_197 = arith.constant 0 : index
    %183 = vector.load %arg7[%c0_194, %c0_195, %c0_196, %c0_197] : memref<1x1x8x8xf32, #tpu.memory_space<vmem>>, vector<1x1x8x8xf32>
    tpu.vector_store %arg7[%c0_194, %c0_195, %c0_196, %c0_197], %182 {strides = array<i32>} : memref<1x1x8x8xf32, #tpu.memory_space<vmem>>, vector<1x1x8x8xf32>,
    return
  }
  func.func @transform_0(%arg0: i32, %arg1: i32) -> (i32, i32, i32, i32, i32) {
    %c0_i32 = arith.constant 0 : i32
    %0 = arith.addi %arg1, %c0_i32 : i32
    %c0_i32_0 = arith.constant 0 : i32
    %c0_i32_1 = arith.constant 0 : i32
    %c0_i32_2 = arith.constant 0 : i32
    %c0_i32_3 = arith.constant 0 : i32
    return %arg0, %0, %c0_i32_0, %c0_i32_1, %c0_i32_2 : i32, i32, i32, i32, i32
  }
  func.func @transform_1(%arg0: i32, %arg1: i32) -> (i32, i32, i32, i32, i32) {
    %c1_i32 = arith.constant 1 : i32
    %0 = arith.addi %arg1, %c1_i32 : i32
    %c0_i32 = arith.constant 0 : i32
    %c0_i32_0 = arith.constant 0 : i32
    %c0_i32_1 = arith.constant 0 : i32
    %c0_i32_2 = arith.constant 0 : i32
    return %arg0, %0, %c0_i32, %c0_i32_0, %c0_i32_1 : i32, i32, i32, i32, i32
  }
  func.func @transform_2(%arg0: i32, %arg1: i32) -> (i32, i32, i32, i32, i32) {
    %c2_i32 = arith.constant 2 : i32
    %0 = arith.addi %arg1, %c2_i32 : i32
    %c0_i32 = arith.constant 0 : i32
    %c0_i32_0 = arith.constant 0 : i32
    %c0_i32_1 = arith.constant 0 : i32
    %c0_i32_2 = arith.constant 0 : i32
    return %arg0, %0, %c0_i32, %c0_i32_0, %c0_i32_1 : i32, i32, i32, i32, i32
  }
  func.func @transform_3(%arg0: i32, %arg1: i32) -> (i32, i32) {
    %c0_i32 = arith.constant 0 : i32
    %c0_i32_0 = arith.constant 0 : i32
    %c0_i32_1 = arith.constant 0 : i32
    return %c0_i32, %c0_i32_0 : i32, i32
  }
  func.func @transform_4(%arg0: i32, %arg1: i32) -> (i32, i32, i32, i32) {
    %c0_i32 = arith.constant 0 : i32
    %c0_i32_0 = arith.constant 0 : i32
    %c0_i32_1 = arith.constant 0 : i32
    return %arg0, %arg1, %c0_i32, %c0_i32_0 : i32, i32, i32, i32
  }
  func.func @transform_5(%arg0: i32, %arg1: i32) -> (i32, i32, i32, i32) {
    %c0_i32 = arith.constant 0 : i32
    %c0_i32_0 = arith.constant 0 : i32
    %c0_i32_1 = arith.constant 0 : i32
    return %arg0, %arg1, %c0_i32, %c0_i32_0 : i32, i32, i32, i32
  }
}

module attributes {stable_mosaic.version = 11 : i64} {
  func.func @bn_relu_kernel(%arg0: i32, %arg1: i32, %arg2: memref<1x1x64x8xf32, #tpu.memory_space<vmem>>, %arg3: memref<8x8xf32, #tpu.memory_space<vmem>>, %arg4: memref<1x1x64x8xf32, #tpu.memory_space<vmem>>) attributes {dimension_semantics = [#tpu.dimension_semantics<parallel>, #tpu.dimension_semantics<parallel>], iteration_bounds = array<i64: 2, 8>, scalar_prefetch = 0 : i64, scratch_operands = 0 : i64, tpu.core_type = #tpu.core_type<tc>, window_params = [{transform_indices = @transform_0, window_bounds = array<i64: 1, 1, 64, 8>}, {pipeline_mode = #tpu.pipeline_mode<synchronous>, transform_indices = @transform_1, window_bounds = array<i64: 8, 8>}, {transform_indices = @transform_2, window_bounds = array<i64: 1, 1, 64, 8>}]} {
    %c0 = arith.constant 0 : index
    %c0_0 = arith.constant 0 : index
    %0 = vector.load %arg3[%c0, %c0_0] : memref<8x8xf32, #tpu.memory_space<vmem>>, vector<1x8xf32>
    %c1 = arith.constant 1 : index
    %c0_1 = arith.constant 0 : index
    %1 = vector.load %arg3[%c1, %c0_1] : memref<8x8xf32, #tpu.memory_space<vmem>>, vector<1x8xf32>
    %c0_2 = arith.constant 0 : index
    %c0_3 = arith.constant 0 : index
    %c0_4 = arith.constant 0 : index
    %c0_5 = arith.constant 0 : index
    %2 = vector.load %arg2[%c0_2, %c0_3, %c0_4, %c0_5] : memref<1x1x64x8xf32, #tpu.memory_space<vmem>>, vector<1x1x64x8xf32>
    %3 = vector.shape_cast %0 : vector<1x8xf32> to vector<1x1x1x8xf32>
    %4 = vector.broadcast %3 : vector<1x1x1x8xf32> to vector<1x1x64x8xf32>
    %5 = arith.mulf %2, %4 : vector<1x1x64x8xf32>
    %6 = vector.shape_cast %1 : vector<1x8xf32> to vector<1x1x1x8xf32>
    %7 = vector.broadcast %6 : vector<1x1x1x8xf32> to vector<1x1x64x8xf32>
    %8 = arith.addf %5, %7 : vector<1x1x64x8xf32>
    %cst = arith.constant 0.000000e+00 : f32
    %9 = vector.broadcast %cst : f32 to vector<1x1x64x8xf32>
    %10 = arith.maximumf %8, %9 : vector<1x1x64x8xf32>
    %c0_6 = arith.constant 0 : index
    %c0_7 = arith.constant 0 : index
    %c0_8 = arith.constant 0 : index
    %c0_9 = arith.constant 0 : index
    %11 = vector.load %arg4[%c0_6, %c0_7, %c0_8, %c0_9] : memref<1x1x64x8xf32, #tpu.memory_space<vmem>>, vector<1x1x64x8xf32>
    tpu.vector_store %arg4[%c0_6, %c0_7, %c0_8, %c0_9], %10 {strides = array<i32>} : memref<1x1x64x8xf32, #tpu.memory_space<vmem>>, vector<1x1x64x8xf32>,
    return
  }
  func.func @transform_0(%arg0: i32, %arg1: i32) -> (i32, i32, i32, i32) {
    %c0_i32 = arith.constant 0 : i32
    %c0_i32_0 = arith.constant 0 : i32
    %c0_i32_1 = arith.constant 0 : i32
    return %arg0, %arg1, %c0_i32, %c0_i32_0 : i32, i32, i32, i32
  }
  func.func @transform_1(%arg0: i32, %arg1: i32) -> (i32, i32) {
    %c0_i32 = arith.constant 0 : i32
    %c0_i32_0 = arith.constant 0 : i32
    %c0_i32_1 = arith.constant 0 : i32
    return %c0_i32, %c0_i32_0 : i32, i32
  }
  func.func @transform_2(%arg0: i32, %arg1: i32) -> (i32, i32, i32, i32) {
    %c0_i32 = arith.constant 0 : i32
    %c0_i32_0 = arith.constant 0 : i32
    %c0_i32_1 = arith.constant 0 : i32
    return %arg0, %arg1, %c0_i32, %c0_i32_0 : i32, i32, i32, i32
  }
}

module attributes {stable_mosaic.version = 11 : i64} {
  func.func @bn_add_relu_kernel(%arg0: i32, %arg1: i32, %arg2: memref<1x1x64x8xf32, #tpu.memory_space<vmem>>, %arg3: memref<8x8xf32, #tpu.memory_space<vmem>>, %arg4: memref<1x1x64x8xf32, #tpu.memory_space<vmem>>, %arg5: memref<1x1x64x8xf32, #tpu.memory_space<vmem>>) attributes {dimension_semantics = [#tpu.dimension_semantics<parallel>, #tpu.dimension_semantics<parallel>], iteration_bounds = array<i64: 2, 8>, scalar_prefetch = 0 : i64, scratch_operands = 0 : i64, tpu.core_type = #tpu.core_type<tc>, window_params = [{transform_indices = @transform_0, window_bounds = array<i64: 1, 1, 64, 8>}, {pipeline_mode = #tpu.pipeline_mode<synchronous>, transform_indices = @transform_1, window_bounds = array<i64: 8, 8>}, {transform_indices = @transform_2, window_bounds = array<i64: 1, 1, 64, 8>}, {transform_indices = @transform_3, window_bounds = array<i64: 1, 1, 64, 8>}]} {
    %c0 = arith.constant 0 : index
    %c0_0 = arith.constant 0 : index
    %0 = vector.load %arg3[%c0, %c0_0] : memref<8x8xf32, #tpu.memory_space<vmem>>, vector<1x8xf32>
    %c1 = arith.constant 1 : index
    %c0_1 = arith.constant 0 : index
    %1 = vector.load %arg3[%c1, %c0_1] : memref<8x8xf32, #tpu.memory_space<vmem>>, vector<1x8xf32>
    %c0_2 = arith.constant 0 : index
    %c0_3 = arith.constant 0 : index
    %c0_4 = arith.constant 0 : index
    %c0_5 = arith.constant 0 : index
    %2 = vector.load %arg2[%c0_2, %c0_3, %c0_4, %c0_5] : memref<1x1x64x8xf32, #tpu.memory_space<vmem>>, vector<1x1x64x8xf32>
    %c0_6 = arith.constant 0 : index
    %c0_7 = arith.constant 0 : index
    %c0_8 = arith.constant 0 : index
    %c0_9 = arith.constant 0 : index
    %3 = vector.load %arg4[%c0_6, %c0_7, %c0_8, %c0_9] : memref<1x1x64x8xf32, #tpu.memory_space<vmem>>, vector<1x1x64x8xf32>
    %4 = vector.shape_cast %0 : vector<1x8xf32> to vector<1x1x1x8xf32>
    %5 = vector.broadcast %4 : vector<1x1x1x8xf32> to vector<1x1x64x8xf32>
    %6 = arith.mulf %2, %5 : vector<1x1x64x8xf32>
    %7 = vector.shape_cast %1 : vector<1x8xf32> to vector<1x1x1x8xf32>
    %8 = vector.broadcast %7 : vector<1x1x1x8xf32> to vector<1x1x64x8xf32>
    %9 = arith.addf %6, %8 : vector<1x1x64x8xf32>
    %10 = arith.addf %9, %3 : vector<1x1x64x8xf32>
    %cst = arith.constant 0.000000e+00 : f32
    %11 = vector.broadcast %cst : f32 to vector<1x1x64x8xf32>
    %12 = arith.maximumf %10, %11 : vector<1x1x64x8xf32>
    %c0_10 = arith.constant 0 : index
    %c0_11 = arith.constant 0 : index
    %c0_12 = arith.constant 0 : index
    %c0_13 = arith.constant 0 : index
    %13 = vector.load %arg5[%c0_10, %c0_11, %c0_12, %c0_13] : memref<1x1x64x8xf32, #tpu.memory_space<vmem>>, vector<1x1x64x8xf32>
    tpu.vector_store %arg5[%c0_10, %c0_11, %c0_12, %c0_13], %12 {strides = array<i32>} : memref<1x1x64x8xf32, #tpu.memory_space<vmem>>, vector<1x1x64x8xf32>,
    return
  }
  func.func @transform_0(%arg0: i32, %arg1: i32) -> (i32, i32, i32, i32) {
    %c0_i32 = arith.constant 0 : i32
    %c0_i32_0 = arith.constant 0 : i32
    %c0_i32_1 = arith.constant 0 : i32
    return %arg0, %arg1, %c0_i32, %c0_i32_0 : i32, i32, i32, i32
  }
  func.func @transform_1(%arg0: i32, %arg1: i32) -> (i32, i32) {
    %c0_i32 = arith.constant 0 : i32
    %c0_i32_0 = arith.constant 0 : i32
    %c0_i32_1 = arith.constant 0 : i32
    return %c0_i32, %c0_i32_0 : i32, i32
  }
  func.func @transform_2(%arg0: i32, %arg1: i32) -> (i32, i32, i32, i32) {
    %c0_i32 = arith.constant 0 : i32
    %c0_i32_0 = arith.constant 0 : i32
    %c0_i32_1 = arith.constant 0 : i32
    return %arg0, %arg1, %c0_i32, %c0_i32_0 : i32, i32, i32, i32
  }
  func.func @transform_3(%arg0: i32, %arg1: i32) -> (i32, i32, i32, i32) {
    %c0_i32 = arith.constant 0 : i32
    %c0_i32_0 = arith.constant 0 : i32
    %c0_i32_1 = arith.constant 0 : i32
    return %arg0, %arg1, %c0_i32, %c0_i32_0 : i32, i32, i32, i32
  }
}

</mosaic_0001>

<bundles_post_ra>
// kernel: resnext_basic_block.5
= control target key start
LH: loop header
LB: loop body
LE: loop exit
PB: predicated region body
PF: predicated region fallthrough
CT: control target
= control target key end

     0   :  { %s436_s9 = smov 0   ;;  %s438_s10 = smov 0   ;;  %s501_s0 = inlined_call_operand.vmem [shape: f32[2,8,64,8], index: 0, kind: input, shape index: {}]   ;;  %s502_s1 = inlined_call_operand.vmem [shape: f32[8,8], index: 1, kind: input, shape index: {}]   ;;  %s503_s2 = inlined_call_operand.vmem [shape: f32[2,8,64,8], index: 2, kind: output, shape index: {}]  }
   0x1   :  { %s440_s11 = smov 0   ;;  %s442_s12 = smov 0  }
   0x2   :  { %s444_s13 = smov 0  }
   0x3 LB: > { %s21_s14 = sadd.s32 1, %s411_s11  ;;  %s24_s15 = sadd.s32 1, %s415_s12  ;;  %s419_s13 = sphi %s444_s13, %s12_s13   ;;  %s415_s12 = sphi %s442_s12, %s507_s12   ;;  %s411_s11 = sphi %s440_s11, %s506_s11   ;;  %s407_s10 = sphi %s438_s10, %s505_s10   ;;  %s403_s9 = sphi %s436_s9, %s504_s9  }
   0x4   : > { %p22_p0 = scmp.ge.s32.totalorder %s21_s14, 8  ;;  %p330_p1 = scmp.ge.s32.totalorder %s419_s13, 1 }
   0x5   : > { %p132_p2 = scmp.lt.s32.totalorder %s419_s13, 17 }
   0x6   : > { %s509_s14 = smov (%p22_p0, %s21_s14), 0  ;;  %s511_s15 = smov (!%p22_p0, %s24_s15), %s415_s12 }
   0x7   : > { %p133_p3 = pnand %p330_p1, %p132_p2  ;;  %p26_p4 = scmp.ge.s32.totalorder %s511_s15, 2 }
   0x8   : > { %p162_p5 = scmp.lt.s32.totalorder (!%p133_p3), %s407_s10, 1  ;;  %p164_p6 = scmp.lt.s32.totalorder (!%p133_p3), %s403_s9, 7  ;;  %v337_v0 = vld [vmem:[%s502_s1] ss:$0 sm:$0xff] (!%p133_p3)  ;;  %v338_v1 = vld [vmem:[%s502_s1 + $0x1] ss:$0 sm:$0xff] (!%p133_p3) }
   0x9   : > { %s513_s15 = smov (%p26_p4, %s511_s15), 0  ;;  %136 = sbr.rel (%p133_p3) target bundleno = 32 (0x20), region = 28 }
   0xa   : > { %vm222_vm0 = vcmask (!%p133_p3), 64512  }
  0x10   : > { %s515_s10 = smov (!%p162_p5, %s407_s10), 1  ;;  %s517_s9 = smov (!%p164_p6, %s403_s9), 7 }
  0x11   : > { %s332_s16 = sshll.u32 %s515_s10, 6  ;;  %s331_s17 = sshll.u32 %s517_s9, 3 }
  0x12   : > { %s168_s18 = sadd.s32 %s332_s16, %s331_s17 }
  0x13   : > { %s333_s19 = sshll.u32 %s168_s18, 3 }
  0x14   : > { %s170_s24 = scalar_lea.vmem %s501_s0, %s333_s19  ;;  %s179_s29 = scalar_lea.vmem %s503_s2, %s333_s19 }
  0x15   : > { %v182_v2 = vld [vmem:[%s170_s24] sm:$0xff]  ;;  %v183_v3 = vld [vmem:[%s170_s24 + $0x8] sm:$0xff]  ;;  %v184_v4 = vld [vmem:[%s170_s24 + $0x10] sm:$0xff] }
  0x16   : > { %v194_v5 = vmul.f32 %v337_v0, %v182_v2  ;;  %v195_v6 = vmul.f32 %v337_v0, %v183_v3  ;;  %v196_v7 = vmul.f32 %v337_v0, %v184_v4  ;;  %v185_v8 = vld [vmem:[%s170_s24 + $0x18] sm:$0xff]  ;;  %v186_v9 = vld [vmem:[%s170_s24 + $0x20] sm:$0xff]  ;;  %v187_v10 = vld [vmem:[%s170_s24 + $0x28] sm:$0xff] }
  0x17   : > { %v197_v11 = vmul.f32 %v337_v0, %v185_v8  ;;  %v198_v12 = vmul.f32 %v337_v0, %v186_v9  ;;  %v199_v13 = vmul.f32 %v337_v0, %v187_v10  ;;  %v188_v14 = vld [vmem:[%s170_s24 + $0x30] sm:$0xff]  ;;  %v189_v15 = vld [vmem:[%s170_s24 + $0x38] sm:$0xff] }
  0x18   : > { %v206_v16 = vadd.f32 %v338_v1, %v194_v5  ;;  %v207_v17 = vadd.f32 %v338_v1, %v195_v6  ;;  %v208_v18 = vadd.f32 %v338_v1, %v196_v7  ;;  %v200_v19 = vmul.f32 %v337_v0, %v188_v14 }
  0x19   : > { %v209_v20 = vadd.f32 %v338_v1, %v197_v11  ;;  %v210_v21 = vadd.f32 %v338_v1, %v198_v12  ;;  %v211_v22 = vadd.f32 %v338_v1, %v199_v13  ;;  %v201_v23 = vmul.f32 %v337_v0, %v189_v15 }
  0x1a   : > { %v214_v24 = vmax.f32 %v206_v16, 0.0  ;;  %v215_v25 = vmax.f32 %v207_v17, 0.0  ;;  %v216_v26 = vmax.f32 %v208_v18, 0.0  ;;  %v212_v27 = vadd.f32 %v338_v1, %v200_v19 }
  0x1b   : > { %v217_v28 = vmax.f32 %v209_v20, 0.0  ;;  %v218_v29 = vmax.f32 %v210_v21, 0.0  ;;  %v219_v30 = vmax.f32 %v211_v22, 0.0  ;;  %v213_v31 = vadd.f32 %v338_v1, %v201_v23 }
  0x1c   : > { %223 = vst.msk [vmem:[%s179_s29] sm:$0xff] %vm222_vm0, %v214_v24  ;;  %224 = vst.msk [vmem:[%s179_s29 + $0x8] sm:$0xff] %vm222_vm0, %v215_v25  ;;  %v220_v32 = vmax.f32 %v212_v27, 0.0 }
  0x1d   : > { %225 = vst.msk [vmem:[%s179_s29 + $0x10] sm:$0xff] %vm222_vm0, %v216_v26  ;;  %226 = vst.msk [vmem:[%s179_s29 + $0x18] sm:$0xff] %vm222_vm0, %v217_v28  ;;  %v221_v33 = vmax.f32 %v213_v31, 0.0 }
  0x1e   : > { %227 = vst.msk [vmem:[%s179_s29 + $0x20] sm:$0xff] %vm222_vm0, %v218_v29  ;;  %228 = vst.msk [vmem:[%s179_s29 + $0x28] sm:$0xff] %vm222_vm0, %v219_v30 }
  0x1f   : > { %229 = vst.msk [vmem:[%s179_s29 + $0x30] sm:$0xff] %vm222_vm0, %v220_v32  ;;  %230 = vst.msk [vmem:[%s179_s29 + $0x38] sm:$0xff] %vm222_vm0, %v221_v33 }
  0x20 PF: > { %s12_s13 = sadd.s32 1, %s419_s13   ;;  %s504_s9 = smov %s411_s11 }
  0x21   : > { %p9_p7 = scmp.ge.s32.totalorder %s12_s13, 18   ;;  %s505_s10 = smov %s415_s12 }
  0x22   : > { %s506_s11 = smov %s509_s14  ;;  %s507_s12 = smov %s513_s15 }
  0x23   :  { %11 = sbr.rel (!%p9_p7) target bundleno = 3 (0x3), region = 58 }

// kernel: resnext_basic_block.4
= control target key start
LH: loop header
LB: loop body
LE: loop exit
PB: predicated region body
PF: predicated region fallthrough
CT: control target
= control target key end

     0   :  { %s5866_s18 = smov 0   ;;  %s5868_s19 = smov 0   ;;  %s6720_s0 = inlined_call_operand.vmem [shape: f32[2,10,10,10,8], index: 0, kind: input, shape index: {}, may-alias: {0,1,2}]   ;;  %s6721_s1 = inlined_call_operand.vmem [shape: f32[2,10,10,10,8], index: 1, kind: input, shape index: {}, may-alias: {0,1,2}]   ;;  %s6722_s2 = inlined_call_operand.vmem [shape: f32[2,10,10,10,8], index: 2, kind: input, shape index: {}, may-alias: {0,1,2}]   ;;  %s6723_s3 = inlined_call_operand.vmem [shape: f32[216,8], index: 3, kind: input, shape index: {}]   ;;  %s6724_s4 = inlined_call_operand.vmem [shape: f32[2,8,64,8], index: 4, kind: output, shape index: {0}]   ;;  %s6725_s5 = inlined_call_operand.vmem [shape: f32[2,8,8,8], index: 5, kind: output, shape index: {1}]  }
   0x1   :  { %s5870_s20 = smov 0   ;;  %s5872_s21 = smov 0  }
   0x2   :  { %s5874_s22 = smov 0  }
   0x3 LB: > { %s25_s23 = sadd.s32 1, %s5826_s20  ;;  %s28_s24 = sadd.s32 1, %s5830_s21  ;;  %s5834_s22 = sphi %s5874_s22, %s16_s22   ;;  %s5830_s21 = sphi %s5872_s21, %s6729_s21   ;;  %s5826_s20 = sphi %s5870_s20, %s6728_s20   ;;  %s5822_s19 = sphi %s5868_s19, %s6727_s19   ;;  %s5818_s18 = sphi %s5866_s18, %s6726_s18  }
   0x4   : > { %p26_p0 = scmp.ge.s32.totalorder %s25_s23, 8  ;;  %p4550_p1 = scmp.ge.s32.totalorder %s5834_s22, 1 }
   0x5   : > { %p252_p2 = scmp.lt.s32.totalorder %s5834_s22, 17 }
   0x6   : > { %s6731_s23 = smov (%p26_p0, %s25_s23), 0  ;;  %s6733_s24 = smov (!%p26_p0, %s28_s24), %s5830_s21 }
   0x7   : > { %p253_p3 = pnand %p4550_p1, %p252_p2  ;;  %p30_p4 = scmp.ge.s32.totalorder %s6733_s24, 2 }
   0x8   : > { %v381_v0 = vld [vmem:[%s6723_s3 + $0x8] sm:$0xff] (!%p253_p3)  ;;  %p316_p5 = scmp.lt.s32.totalorder (!%p253_p3), %s5822_s19, 1  ;;  %p318_p6 = scmp.lt.s32.totalorder (!%p253_p3), %s5818_s18, 9  ;;  %v372_v2 = vld [vmem:[%s6723_s3] sm:$0xff] (!%p253_p3)  ;;  %v2404_v3 = vld [vmem:[%s6723_s3 + $0x70] sm:$0xff] (!%p253_p3)  ;;  %vm382_vm0 = vcmask (!%p253_p3), 64512  }
   0x9   : > { %s6735_s24 = smov (%p30_p4, %s6733_s24), 0  ;;  %256 = sbr.rel (%p253_p3) target bundleno = 477 (0x1dd), region = 36 }
   0xa   : > { %v5904_v1 = vld [vmem:[%s6723_s3 + $0x68] sm:$0xff] (!%p253_p3)  ;;  %5164 = vmatprep.subr.mxu1 (!%p253_p3), %v381_v0  ;;  %s325_s6 = sadd.s32 (!%p253_p3), 1, %s5818_s18  ;;  %v649_v7 = vld [vmem:[%s6723_s3 + $0x10] sm:$0xff] (!%p253_p3)  ;;  %v2551_v13 = vld [vmem:[%s6723_s3 + $0x78] sm:$0xff] (!%p253_p3)  ;;  %s336_s28 = sadd.s32 (!%p253_p3), 2, %s5818_s18 }
   0xb   : > { %5346 = vmatprep.subr.mxu0 (!%p253_p3), %v5904_v1  ;;  %5165 = vmatpush3.msra.mxu1 (!%p253_p3), %v381_v0  ;;  %p328_p7 = scmp.lt.s32.totalorder (!%p253_p3), %s325_s6, 9  ;;  %v2697_v22 = vld [vmem:[%s6723_s3 + $0x80] sm:$0xff] (!%p253_p3)  ;;  %v796_v27 = vld [vmem:[%s6723_s3 + $0x18] sm:$0xff] (!%p253_p3)  ;;  %v2843_v40 = vld [vmem:[%s6723_s3 + $0x88] sm:$0xff] (!%p253_p3)  ;;  %p339_p8 = scmp.lt.s32.totalorder (!%p253_p3), %s336_s28, 9 }
   0xc   : > { %5347 = vmatpush3.msra.mxu0 (!%p253_p3), %v5904_v1  ;;  %5178 = vmatprep.subr.mxu1 (!%p253_p3), %v372_v2  ;;  %v942_v45 = vld [vmem:[%s6723_s3 + $0x20] sm:$0xff] (!%p253_p3)  ;;  %v2989_v54 = vld [vmem:[%s6723_s3 + $0x90] sm:$0xff] (!%p253_p3)  ;;  %v1088_v57 = vld [vmem:[%s6723_s3 + $0x28] sm:$0xff] (!%p253_p3)  ;;  %p349_p9 = scmp.lt.s32.totalorder (!%p253_p3), %s5818_s18, 7 }
   0xd   : > { %5360 = vmatprep.subr.mxu0 (!%p253_p3), %v2404_v3  ;;  %v3135_v62 = vld [vmem:[%s6723_s3 + $0x98] sm:$0xff] (!%p253_p3)  ;;  %v1235_v63 = vld [vmem:[%s6723_s3 + $0x30] sm:$0xff] (!%p253_p3) }
  0x10   : > { %s6737_s19 = smov (!%p316_p5, %s5822_s19), 1  ;;  %s6739_s6 = smov (!%p328_p7, %s325_s6), 9 }
  0x11   : > { %s319_s9 = scalar_select %p318_p6, %s5818_s18, 9 }
  0x12   : > { %s5920_s10 = smul.u32 200, %s6737_s19  ;;  %s6741_s28 = smov (!%p339_p8, %s336_s28), 9 }
  0x13   : > { %s5752_s11 = smul.u32 20, %s319_s9  ;;  %s6743_s18 = smov (!%p349_p9, %s5818_s18), 7 }
  0x14   : > { %s5754_s14 = smul.u32 20, %s6739_s6 }
  0x15   : > { %s322_s12 = sadd.s32 %s5920_s10, %s5752_s11  ;;  %s5755_s7 = smul.u32 20, %s6741_s28 }
  0x16   : > { %s4551_s13 = sshll.u32 %s322_s12, 3  ;;  %s332_s25 = sadd.s32 %s5754_s14, %s5920_s10 }
  0x17   : > { %s5926_s17 = scalar_lea.vmem %s6720_s0, %s4551_s13  ;;  %s4552_s26 = sshll.u32 %s332_s25, 3 }
  0x18   : > { %v373_v4 = vld [vmem:[%s5926_s17 + $0x1] sm:$0xff]  ;;  %v5930_v5 = vld [vmem:[%s5926_s17 + $0x11] sm:$0xff]  ;;  %s5945_s6 = scalar_lea.vmem %s6721_s1, %s4552_s26  ;;  %s343_s11 = sadd.s32 %s5755_s7, %s5920_s10 }
  0x19   : > { %v5934_v6 = vld [vmem:[%s5926_s17 + $0x21] sm:$0xff]  ;;  %5166 = vmatprep.mubr.msk.f32.mxu1 %vm382_vm0, %v373_v4  ;;  %v5948_v8 = vld [vmem:[%s5945_s6 + $0x11] sm:$0xff]  ;;  %s4553_s12 = sshll.u32 %s343_s11, 3 }
  0x1a   : > { %5167 = vmatmul.mubr.msk.f32.vlgmr.msra.gmra.mrb[0].mxu1 %vm382_vm0, %v5930_v5  ;;  %v5951_v9 = vld [vmem:[%s5945_s6 + $0x21] sm:$0xff]  ;;  %v5956_v10 = vld [vmem:[%s5926_s17 + $0x31] sm:$0xff]  ;;  %5348 = vmatprep.mubr.msk.f32.mxu0 %vm382_vm0, %v5948_v8  ;;  %s6240_s16 = scalar_lea.vmem %s6722_s2, %s4553_s12  ;;  %s4555_s12 = sshll.u32 %s6737_s19, 6 }
  0x1b   : > { %5179 = vmatpush3.msra.mxu1 %v372_v2  ;;  %5169 = vmatprep.mubr.msk.f32.mxu1 %vm382_vm0, %v5934_v6  ;;  %v5961_v11 = vld [vmem:[%s5945_s6 + $0x31] sm:$0xff]  ;;  %v5964_v12 = vld [vmem:[%s5926_s17 + $0x41] sm:$0xff] }
  0x1c   : > { %5192 = vmatprep.subr.mxu1 %v649_v7  ;;  %5349 = vmatmul.mubr.msk.f32.vlgmr.msra.gmra.mrb[0].mxu0 %vm382_vm0, %v5951_v9  ;;  %v5974_v14 = vld [vmem:[%s5945_s6 + $0x41] sm:$0xff]  ;;  %v5981_v15 = vld [vmem:[%s5926_s17 + $0x51] sm:$0xff] }
  0x1d   : > { %5361 = vmatpush3.msra.mxu0 %v2404_v3  ;;  %5351 = vmatprep.mubr.msk.f32.mxu0 %vm382_vm0, %v5961_v11  ;;  %v5984_v16 = vld [vmem:[%s5945_s6 + $0x12] sm:$0xff]  ;;  %v5987_v17 = vld [vmem:[%s5926_s17 + $0x61] sm:$0xff] }
  0x1e   : > { %5170 = vmatmul.mubr.msk.f32.gmra.mrb[2].mxu1 %vm382_vm0, %v5956_v10  ;;  %5374 = vmatprep.subr.mxu0 %v2551_v13  ;;  %v5996_v18 = vld [vmem:[%s5945_s6 + $0x22] sm:$0xff]  ;;  %v6001_v19 = vld [vmem:[%s5926_s17 + $0x71] sm:$0xff] }
  0x1f   : > { %5172 = vmatprep.mubr.msk.f32.mxu1 %vm382_vm0, %v5964_v12  ;;  %v6004_v20 = vld [vmem:[%s5945_s6 + $0x32] sm:$0xff]  ;;  %v364_v21 = vld [vmem:[%s5926_s17] sm:$0xff] }
  0x20   : > { %5352 = vmatmul.mubr.msk.f32.gmra.mrb[2].mxu0 %vm382_vm0, %v5974_v14  ;;  %v6015_v23 = vld [vmem:[%s5945_s6 + $0x42] sm:$0xff]  ;;  %v6021_v24 = vld [vmem:[%s5926_s17 + $0x10] sm:$0xff] }
  0x21   : > { %5362 = vmatprep.mubr.msk.f32.mxu0 %vm382_vm0, %v5984_v16  ;;  %v6024_v25 = vld [vmem:[%s5945_s6 + $0x52] sm:$0xff]  ;;  %v6027_v26 = vld [vmem:[%s5926_s17 + $0x20] sm:$0xff] }
  0x22   : > { %5173 = vmatmul.mubr.msk.f32.gmra.mrb[4].mxu1 %vm382_vm0, %v5981_v15  ;;  %v6039_v28 = vld [vmem:[%s5945_s6 + $0x62] sm:$0xff]  ;;  %v6044_v29 = vld [vmem:[%s5926_s17 + $0x30] sm:$0xff] }
  0x23   : > { %5175 = vmatprep.mubr.msk.f32.mxu1 %vm382_vm0, %v5987_v17  ;;  %v6047_v30 = vld [vmem:[%s5945_s6 + $0x72] sm:$0xff]  ;;  %v6050_v31 = vld [vmem:[%s5926_s17 + $0x40] sm:$0xff] }
  0x24   : > { %5363 = vmatmul.mubr.msk.f32.vlgmr.msra.gmra.mrb[0].mxu0 %vm382_vm0, %v5996_v18  ;;  %v6059_v32 = vld [vmem:[%s5945_s6 + $0x82] sm:$0xff]  ;;  %v6064_v33 = vld [vmem:[%s5926_s17 + $0x50] sm:$0xff] }
  0x25   : > { %5375 = vmatpush3.msra.mxu0 %v2551_v13  ;;  %5365 = vmatprep.mubr.msk.f32.mxu0 %vm382_vm0, %v6004_v20  ;;  %v6067_v34 = vld [vmem:[%s5945_s6 + $0x20] sm:$0xff]  ;;  %v6079_v36 = vld [vmem:[%s5945_s6 + $0x30] sm:$0xff] }
  0x26   : > { %5176 = vmatmul.mubr.msk.f32.gmra.mrb[6].mxu1 %vm382_vm0, %v6001_v19  ;;  %5388 = vmatprep.subr.mxu0 %v2697_v22  ;;  %v6070_v35 = vld [vmem:[%s5926_s17 + $0x60] sm:$0xff]  ;;  %v6084_v37 = vld [vmem:[%s5926_s17 + $0x70] sm:$0xff] }
  0x27   : > { %5180 = vmatprep.mubr.msk.f32.mxu1 %vm382_vm0, %v364_v21  ;;  %v6087_v38 = vld [vmem:[%s5945_s6 + $0x40] sm:$0xff]  ;;  %v6098_v41 = vld [vmem:[%s5945_s6 + $0x50] sm:$0xff] }
  0x28   : > { %5366 = vmatmul.mubr.msk.f32.gmra.mrb[2].mxu0 %vm382_vm0, %v6015_v23  ;;  %v641_v39 = vld [vmem:[%s5926_s17 + $0x2] sm:$0xff]  ;;  %v6104_v42 = vld [vmem:[%s5926_s17 + $0x12] sm:$0xff] }
  0x29   : > { %5368 = vmatprep.mubr.msk.f32.mxu0 %vm382_vm0, %v6024_v25  ;;  %v6107_v43 = vld [vmem:[%s5945_s6 + $0x60] sm:$0xff]  ;;  %v6122_v46 = vld [vmem:[%s5945_s6 + $0x70] sm:$0xff] }
  0x2a   : > { %5181 = vmatmul.mubr.msk.f32.vlgmr.msra.gmra.mrb[0].mxu1 %vm382_vm0, %v6021_v24  ;;  %v6110_v44 = vld [vmem:[%s5926_s17 + $0x22] sm:$0xff]  ;;  %v6127_v47 = vld [vmem:[%s5926_s17 + $0x32] sm:$0xff] }
  0x2b   : > { %5193 = vmatpush3.msra.mxu1 %v649_v7  ;;  %5183 = vmatprep.mubr.msk.f32.mxu1 %vm382_vm0, %v6027_v26  ;;  %v6130_v48 = vld [vmem:[%s5945_s6 + $0x80] sm:$0xff]  ;;  %v4758_v50 = vld [vmem:[%s5945_s6 + $0x90] sm:$0xff] }
  0x2c   : > { %5206 = vmatprep.subr.mxu1 %v796_v27  ;;  %5369 = vmatmul.mubr.msk.f32.gmra.mrb[4].mxu0 %vm382_vm0, %v6039_v28  ;;  %v6133_v49 = vld [vmem:[%s5926_s17 + $0x42] sm:$0xff]  ;;  %v6145_v51 = vld [vmem:[%s5926_s17 + $0x52] sm:$0xff] }
  0x2d   : > { %5371 = vmatprep.mubr.msk.f32.mxu0 %vm382_vm0, %v6047_v30  ;;  %v6148_v52 = vld [vmem:[%s5926_s17 + $0x62] sm:$0xff]  ;;  %v6158_v53 = vld [vmem:[%s5926_s17 + $0x72] sm:$0xff] }
  0x2e   : > { %5184 = vmatmul.mubr.msk.f32.gmra.mrb[2].mxu1 %vm382_vm0, %v6044_v29  ;;  %v6168_v55 = vld [vmem:[%s5945_s6 + $0x51] sm:$0xff]  ;;  %v6175_v56 = vld [vmem:[%s5945_s6 + $0x61] sm:$0xff] }
  0x2f   : > { %5186 = vmatprep.mubr.msk.f32.mxu1 %vm382_vm0, %v6050_v31  ;;  %v6188_v58 = vld [vmem:[%s5945_s6 + $0x71] sm:$0xff]  ;;  %v6193_v59 = vld [vmem:[%s5945_s6 + $0x81] sm:$0xff] }
  0x30   : > { %5372 = vmatmul.mubr.msk.f32.gmra.mrb[6].mxu0 %vm382_vm0, %v6059_v32  ;;  %v4774_v60 = vld [vmem:[%s5945_s6 + $0x91] sm:$0xff]  ;;  %v6212_v61 = vld [vmem:[%s5926_s17 + $0x80] sm:$0xff] }
  0x31   : > { %5376 = vmatprep.mubr.msk.f32.mxu0 %vm382_vm0, %v6067_v34  ;;  %v4790_v0 = vld [vmem:[%s5945_s6 + $0x92] sm:$0xff]  ;;  %v2981_v2 = vld [vmem:[%s6240_s16] sm:$0xff] }
  0x32   : > { %5187 = vmatmul.mubr.msk.f32.gmra.mrb[4].mxu1 %vm382_vm0, %v6064_v33  ;;  %v6257_v3 = vld [vmem:[%s6240_s16 + $0x10] sm:$0xff]  ;;  %v6262_v4 = vld [vmem:[%s5926_s17 + $0x81] sm:$0xff] }
  0x33   : > { %5189 = vmatprep.mubr.msk.f32.mxu1 %vm382_vm0, %v6070_v35  ;;  %v3281_v7 = vld [vmem:[%s6723_s3 + $0xa0] sm:$0xff]  ;;  %v6275_v13 = vld [vmem:[%s6240_s16 + $0x30] sm:$0xff] }
  0x34   : > { %5377 = vmatmul.mubr.msk.f32.vlgmr.msra.gmra.mrb[0].mxu0 %vm382_vm0, %v6079_v36  ;;  %v6282_v21 = vld [vmem:[%s6240_s16 + $0x40] sm:$0xff] }
  0x35   : > { %5389 = vmatpush3.msra.mxu0 %v2697_v22  ;;  %5379 = vmatprep.mubr.msk.f32.mxu0 %vm382_vm0, %v6087_v38  ;;  %v1381_v22 = vld [vmem:[%s6723_s3 + $0x38] sm:$0xff] }
  0x36   : > { %5190 = vmatmul.mubr.msk.f32.gmra.mrb[6].mxu1 %vm382_vm0, %v6084_v37  ;;  %5402 = vmatprep.subr.mxu0 %v2843_v40 }
  0x37   : > { %5194 = vmatprep.mubr.msk.f32.mxu1 %vm382_vm0, %v641_v39  ;;  %v3127_v39 = vld [vmem:[%s6240_s16 + $0x1] sm:$0xff] }
  0x38   : > { %5380 = vmatmul.mubr.msk.f32.gmra.mrb[2].mxu0 %vm382_vm0, %v6098_v41 }
  0x39   : > { %5382 = vmatprep.mubr.msk.f32.mxu0 %vm382_vm0, %v6107_v43 }
  0x3a   : > { %5195 = vmatmul.mubr.msk.f32.vlgmr.msra.gmra.mrb[0].mxu1 %vm382_vm0, %v6104_v42 }
  0x3b   : > { %5207 = vmatpush3.msra.mxu1 %v796_v27  ;;  %5197 = vmatprep.mubr.msk.f32.mxu1 %vm382_vm0, %v6110_v44  ;;  %v6299_v27 = vld [vmem:[%s6240_s16 + $0x60] sm:$0xff] }
  0x3c   : > { %5220 = vmatprep.subr.mxu1 %v942_v45  ;;  %5383 = vmatmul.mubr.msk.f32.gmra.mrb[4].mxu0 %vm382_vm0, %v6122_v46 }
  0x3d   : > { %5385 = vmatprep.mubr.msk.f32.mxu0 %vm382_vm0, %v6130_v48 }
  0x3e   : > { %5198 = vmatmul.mubr.msk.f32.gmra.mrb[2].mxu1 %vm382_vm0, %v6127_v47 }
  0x3f   : > { %5200 = vmatprep.mubr.msk.f32.mxu1 %vm382_vm0, %v6133_v49 }
  0x40   : > { %5386 = vmatmul.mubr.msk.f32.gmra.mrb[6].mxu0 %vm382_vm0, %v4758_v50  ;;  %v3428_v50 = vld [vmem:[%s6723_s3 + $0xa8] sm:$0xff] }
  0x41   : > { %5390 = vmatprep.mubr.msk.f32.mxu0 %vm382_vm0, %v5951_v9 }
  0x42   : > { %5201 = vmatmul.mubr.msk.f32.gmra.mrb[4].mxu1 %vm382_vm0, %v6145_v51 }
  0x43   : > { %5203 = vmatprep.mubr.msk.f32.mxu1 %vm382_vm0, %v6148_v52 }
  0x44   : > { %5391 = vmatmul.mubr.msk.f32.vlgmr.msra.gmra.mrb[0].mxu0 %vm382_vm0, %v5961_v11 }
  0x45   : > { %5403 = vmatpush3.msra.mxu0 %v2843_v40  ;;  %5393 = vmatprep.mubr.msk.f32.mxu0 %vm382_vm0, %v5974_v14  ;;  %v6319_v40 = vld [vmem:[%s6240_s16 + $0x11] sm:$0xff] }
  0x46   : > { %5204 = vmatmul.mubr.msk.f32.gmra.mrb[6].mxu1 %vm382_vm0, %v6158_v53  ;;  %5416 = vmatprep.subr.mxu0 %v2989_v54 }
  0x47   : > { %5208 = vmatprep.mubr.msk.f32.mxu1 %vm382_vm0, %v6021_v24  ;;  %v6294_v24 = vld [vmem:[%s6240_s16 + $0x50] sm:$0xff] }
  0x48   : > { %5394 = vmatmul.mubr.msk.f32.gmra.mrb[2].mxu0 %vm382_vm0, %v6168_v55 }
  0x49   : > { %5396 = vmatprep.mubr.msk.f32.mxu0 %vm382_vm0, %v6175_v56 }
  0x4a   : > { %5209 = vmatmul.mubr.msk.f32.vlgmr.msra.gmra.mrb[0].mxu1 %vm382_vm0, %v6027_v26 }
  0x4b   : > { %5221 = vmatpush3.msra.mxu1 %v942_v45  ;;  %5211 = vmatprep.mubr.msk.f32.mxu1 %vm382_vm0, %v6044_v29  ;;  %v6327_v45 = vld [vmem:[%s6240_s16 + $0x21] sm:$0xff] }
  0x4c   : > { %5234 = vmatprep.subr.mxu1 %v1088_v57  ;;  %5397 = vmatmul.mubr.msk.f32.gmra.mrb[4].mxu0 %vm382_vm0, %v6188_v58 }
  0x4d   : > { %5399 = vmatprep.mubr.msk.f32.mxu0 %vm382_vm0, %v6193_v59 }
  0x4e   : > { %5212 = vmatmul.mubr.msk.f32.gmra.mrb[2].mxu1 %vm382_vm0, %v6050_v31 }
  0x4f   : > { %5214 = vmatprep.mubr.msk.f32.mxu1 %vm382_vm0, %v6064_v33 }
  0x50   : > { %5400 = vmatmul.mubr.msk.f32.gmra.mrb[6].mxu0 %vm382_vm0, %v4774_v60  ;;  %v1527_v60 = vld [vmem:[%s6723_s3 + $0x40] sm:$0xff] }
  0x51   : > { %5404 = vmatprep.mubr.msk.f32.mxu0 %vm382_vm0, %v5996_v18 }
  0x52   : > { %5215 = vmatmul.mubr.msk.f32.gmra.mrb[4].mxu1 %vm382_vm0, %v6070_v35 }
  0x53   : > { %5217 = vmatprep.mubr.msk.f32.mxu1 %vm382_vm0, %v6084_v37 }
  0x54   : > { %5405 = vmatmul.mubr.msk.f32.vlgmr.msra.gmra.mrb[0].mxu0 %vm382_vm0, %v6004_v20 }
  0x55   : > { %5417 = vmatpush3.msra.mxu0 %v2989_v54  ;;  %5407 = vmatprep.mubr.msk.f32.mxu0 %vm382_vm0, %v6015_v23  ;;  %v6337_v54 = vld [vmem:[%s6240_s16 + $0x31] sm:$0xff] }
  0x56   : > { %5218 = vmatmul.mubr.msk.f32.gmra.mrb[6].mxu1 %vm382_vm0, %v6212_v61  ;;  %5430 = vmatprep.subr.mxu0 %v3135_v62 }
  0x57   : > { %5222 = vmatprep.mubr.msk.f32.mxu1 %vm382_vm0, %v5930_v5  ;;  %v6265_v5 = vld [vmem:[%s6240_s16 + $0x20] sm:$0xff] }
  0x58   : > { %5408 = vmatmul.mubr.msk.f32.gmra.mrb[2].mxu0 %vm382_vm0, %v6024_v25 }
  0x59   : > { %5410 = vmatprep.mubr.msk.f32.mxu0 %vm382_vm0, %v6039_v28 }
  0x5a   : > { %5223 = vmatmul.mubr.msk.f32.vlgmr.msra.gmra.mrb[0].mxu1 %vm382_vm0, %v5934_v6 }
  0x5b   : > { %5235 = vmatpush3.msra.mxu1 %v1088_v57  ;;  %5225 = vmatprep.mubr.msk.f32.mxu1 %vm382_vm0, %v5956_v10  ;;  %v6344_v57 = vld [vmem:[%s6240_s16 + $0x41] sm:$0xff] }
  0x5c   : > { %5248 = vmatprep.subr.mxu1 %v1235_v63  ;;  %5411 = vmatmul.mubr.msk.f32.gmra.mrb[4].mxu0 %vm382_vm0, %v6047_v30 }
  0x5d   : > { %5413 = vmatprep.mubr.msk.f32.mxu0 %vm382_vm0, %v6059_v32  ;;  %v6308_v32 = vld [vmem:[%s6240_s16 + $0x70] sm:$0xff] }
  0x5e   : > { %5226 = vmatmul.mubr.msk.f32.gmra.mrb[2].mxu1 %vm382_vm0, %v5964_v12 }
  0x5f   : > { %5228 = vmatprep.mubr.msk.f32.mxu1 %vm382_vm0, %v5981_v15 }
  0x60   : > { %5414 = vmatmul.mubr.msk.f32.gmra.mrb[6].mxu0 %vm382_vm0, %v4790_v0  ;;  %v6387_v0 = vld [vmem:[%s6240_s16 + $0x22] sm:$0xff] }
  0x61   : > { %5418 = vmatprep.mubr.msk.f32.mxu0 %vm382_vm0, %v2981_v2  ;;  %v1673_v2 = vld [vmem:[%s6723_s3 + $0x48] sm:$0xff] }
  0x62   : > { %5229 = vmatmul.mubr.msk.f32.gmra.mrb[4].mxu1 %vm382_vm0, %v5987_v17 }
  0x63   : > { %5231 = vmatprep.mubr.msk.f32.mxu1 %vm382_vm0, %v6001_v19 }
  0x64   : > { %5419 = vmatmul.mubr.msk.f32.vlgmr.msra.gmra.mrb[0].mxu0 %vm382_vm0, %v6257_v3 }
  0x65   : > { %5431 = vmatpush3.msra.mxu0 %v3135_v62  ;;  %5421 = vmatprep.mubr.msk.f32.mxu0 %vm382_vm0, %v6265_v5  ;;  %v6356_v62 = vld [vmem:[%s6240_s16 + $0x51] sm:$0xff] }
  0x66   : > { %5232 = vmatmul.mubr.msk.f32.gmra.mrb[6].mxu1 %vm382_vm0, %v6262_v4  ;;  %5444 = vmatprep.subr.mxu0 %v3281_v7 }
  0x67   : > { %5236 = vmatprep.mubr.msk.f32.mxu1 %vm382_vm0, %v6104_v42  ;;  %v6324_v42 = vld [vmem:[%s5926_s17 + $0x82] sm:$0xff] }
  0x68   : > { %5422 = vmatmul.mubr.msk.f32.gmra.mrb[2].mxu0 %vm382_vm0, %v6275_v13 }
  0x69   : > { %5424 = vmatprep.mubr.msk.f32.mxu0 %vm382_vm0, %v6282_v21 }
  0x6a   : > { %5237 = vmatmul.mubr.msk.f32.vlgmr.msra.gmra.mrb[0].mxu1 %vm382_vm0, %v6110_v44 }
  0x6b   : > { %5249 = vmatpush3.msra.mxu1 %v1235_v63  ;;  %5239 = vmatprep.mubr.msk.f32.mxu1 %vm382_vm0, %v6127_v47  ;;  %v4638_v63 = vld [vmem:[%s5926_s17 + $0x90] sm:$0xff] }
  0x6c   : > { %5262 = vmatprep.subr.mxu1 %v1381_v22  ;;  %5425 = vmatmul.mubr.msk.f32.gmra.mrb[4].mxu0 %vm382_vm0, %v6294_v24 }
  0x6d   : > { %5427 = vmatprep.mubr.msk.f32.mxu0 %vm382_vm0, %v6299_v27 }
  0x6e   : > { %5240 = vmatmul.mubr.msk.f32.gmra.mrb[2].mxu1 %vm382_vm0, %v6133_v49 }
  0x6f   : > { %5242 = vmatprep.mubr.msk.f32.mxu1 %vm382_vm0, %v6145_v51 }
  0x70   : > { %5428 = vmatmul.mubr.msk.f32.gmra.mrb[6].mxu0 %vm382_vm0, %v6308_v32 }
  0x71   : > { %5432 = vmatprep.mubr.msk.f32.mxu0 %vm382_vm0, %v3127_v39  ;;  %v4862_v39 = vld [vmem:[%s6240_s16 + $0x82] sm:$0xff] }
  0x72   : > { %5243 = vmatmul.mubr.msk.f32.gmra.mrb[4].mxu1 %vm382_vm0, %v6148_v52 }
  0x73   : > { %5245 = vmatprep.mubr.msk.f32.mxu1 %vm382_vm0, %v6158_v53 }
  0x74   : > { %5433 = vmatmul.mubr.msk.f32.vlgmr.msra.gmra.mrb[0].mxu0 %vm382_vm0, %v6319_v40 }
  0x75   : > { %5445 = vmatpush3.msra.mxu0 %v3281_v7  ;;  %5435 = vmatprep.mubr.msk.f32.mxu0 %vm382_vm0, %v6327_v45  ;;  %v6415_v7 = vld [vmem:[%s6240_s16 + $0x52] sm:$0xff] }
  0x76   : > { %5246 = vmatmul.mubr.msk.f32.gmra.mrb[6].mxu1 %vm382_vm0, %v6324_v42  ;;  %5458 = vmatprep.subr.mxu0 %v3428_v50 }
  0x77   : > { %5250 = vmatprep.mubr.msk.f32.mxu1 %vm382_vm0, %v6027_v26  ;;  %v6361_v26 = vld [vmem:[%s6240_s16 + $0x61] sm:$0xff] }
  0x78   : > { %5436 = vmatmul.mubr.msk.f32.gmra.mrb[2].mxu0 %vm382_vm0, %v6337_v54 }
  0x79   : > { %5438 = vmatprep.mubr.msk.f32.mxu0 %vm382_vm0, %v6344_v57 }
  0x7a   : > { %5251 = vmatmul.mubr.msk.f32.vlgmr.msra.gmra.mrb[0].mxu1 %vm382_vm0, %v6044_v29  ;;  %v6370_v29 = vld [vmem:[%s6240_s16 + $0x71] sm:$0xff] }
  0x7b   : > { %5263 = vmatpush3.msra.mxu1 %v1381_v22  ;;  %5253 = vmatprep.mubr.msk.f32.mxu1 %vm382_vm0, %v6050_v31  ;;  %v3273_v31 = vld [vmem:[%s6240_s16 + $0x2] sm:$0xff] }
  0x7c   : > { %5276 = vmatprep.subr.mxu1 %v1527_v60  ;;  %5439 = vmatmul.mubr.msk.f32.gmra.mrb[4].mxu0 %vm382_vm0, %v6356_v62  ;;  %v2112_v22 = vld [vmem:[%s6723_s3 + $0x60] sm:$0xff] }
  0x7d   : > { %5441 = vmatprep.mubr.msk.f32.mxu0 %vm382_vm0, %v6361_v26 }
  0x7e   : > { %5254 = vmatmul.mubr.msk.f32.gmra.mrb[2].mxu1 %vm382_vm0, %v6064_v33  ;;  %v6381_v33 = vld [vmem:[%s6240_s16 + $0x12] sm:$0xff] }
  0x7f   : > { %5256 = vmatprep.mubr.msk.f32.mxu1 %vm382_vm0, %v6070_v35  ;;  %v3574_v35 = vld [vmem:[%s6723_s3 + $0xb0] sm:$0xff] }
  0x80   : > { %5442 = vmatmul.mubr.msk.f32.gmra.mrb[6].mxu0 %vm382_vm0, %v6370_v29 }
  0x81   : > { %5446 = vmatprep.mubr.msk.f32.mxu0 %vm382_vm0, %v3273_v31 }
  0x82   : > { %5257 = vmatmul.mubr.msk.f32.gmra.mrb[4].mxu1 %vm382_vm0, %v6084_v37  ;;  %v6396_v37 = vld [vmem:[%s6240_s16 + $0x32] sm:$0xff] }
  0x83   : > { %5259 = vmatprep.mubr.msk.f32.mxu1 %vm382_vm0, %v6212_v61  ;;  %v6403_v61 = vld [vmem:[%s6240_s16 + $0x42] sm:$0xff] }
  0x84   : > { %5447 = vmatmul.mubr.msk.f32.vlgmr.msra.gmra.mrb[0].mxu0 %vm382_vm0, %v6381_v33 }
  0x85   : > { %5459 = vmatpush3.msra.mxu0 %v3428_v50  ;;  %5449 = vmatprep.mubr.msk.f32.mxu0 %vm382_vm0, %v6387_v0 }
  0x86   : > { %5260 = vmatmul.mubr.msk.f32.gmra.mrb[6].mxu1 %vm382_vm0, %v4638_v63  ;;  %5472 = vmatprep.subr.mxu0 %v3574_v35 }
  0x87   : > { %5264 = vmatprep.mubr.msk.f32.mxu1 %vm382_vm0, %v5934_v6  ;;  %v6420_v6 = vld [vmem:[%s6240_s16 + $0x62] sm:$0xff] }
  0x88   : > { %5450 = vmatmul.mubr.msk.f32.gmra.mrb[2].mxu0 %vm382_vm0, %v6396_v37 }
  0x89   : > { %5452 = vmatprep.mubr.msk.f32.mxu0 %vm382_vm0, %v6403_v61 }
  0x8a   : > { %5265 = vmatmul.mubr.msk.f32.vlgmr.msra.gmra.mrb[0].mxu1 %vm382_vm0, %v5956_v10  ;;  %v6429_v10 = vld [vmem:[%s6240_s16 + $0x72] sm:$0xff] }
  0x8b   : > { %5277 = vmatpush3.msra.mxu1 %v1527_v60  ;;  %5267 = vmatprep.mubr.msk.f32.mxu1 %vm382_vm0, %v5964_v12  ;;  %v4654_v12 = vld [vmem:[%s5926_s17 + $0x91] sm:$0xff] }
  0x8c   : > { %5290 = vmatprep.subr.mxu1 %v1673_v2  ;;  %5453 = vmatmul.mubr.msk.f32.gmra.mrb[4].mxu0 %vm382_vm0, %v6415_v7 }
  0x8d   : > { %5455 = vmatprep.mubr.msk.f32.mxu0 %vm382_vm0, %v6420_v6 }
  0x8e   : > { %5268 = vmatmul.mubr.msk.f32.gmra.mrb[2].mxu1 %vm382_vm0, %v5981_v15  ;;  %v3720_v15 = vld [vmem:[%s6723_s3 + $0xb8] sm:$0xff] }
  0x8f   : > { %5270 = vmatprep.mubr.msk.f32.mxu1 %vm382_vm0, %v5987_v17  ;;  %v1819_v17 = vld [vmem:[%s6723_s3 + $0x50] sm:$0xff] }
  0x90   : > { %5456 = vmatmul.mubr.msk.f32.gmra.mrb[6].mxu0 %vm382_vm0, %v6429_v10 }
  0x91   : > { %5460 = vmatprep.mubr.msk.f32.mxu0 %vm382_vm0, %v6257_v3  ;;  %v1811_v3 = vld [vmem:[%s5945_s6 + $0x1] sm:$0xff] }
  0x92   : > { %5271 = vmatmul.mubr.msk.f32.gmra.mrb[4].mxu1 %vm382_vm0, %v6001_v19  ;;  %v6470_v19 = vld [vmem:[%s6240_s16 + $0x80] sm:$0xff] }
  0x93   : > { %5273 = vmatprep.mubr.msk.f32.mxu1 %vm382_vm0, %v6262_v4  ;;  %v4013_v4 = vld [vmem:[%s6723_s3 + $0xc8] sm:$0xff] }
  0x94   : > { %5461 = vmatmul.mubr.msk.f32.vlgmr.msra.gmra.mrb[0].mxu0 %vm382_vm0, %v6265_v5 }
  0x95   : > { %5473 = vmatpush3.msra.mxu0 %v3574_v35  ;;  %5463 = vmatprep.mubr.msk.f32.mxu0 %vm382_vm0, %v6275_v13 }
  0x96   : > { %5274 = vmatmul.mubr.msk.f32.gmra.mrb[6].mxu1 %vm382_vm0, %v4654_v12  ;;  %5486 = vmatprep.subr.mxu0 %v3720_v15 }
  0x97   : > { %5278 = vmatprep.mubr.msk.f32.mxu1 %vm382_vm0, %v6110_v44  ;;  %v4670_v44 = vld [vmem:[%s5926_s17 + $0x92] sm:$0xff] }
  0x98   : > { %5464 = vmatmul.mubr.msk.f32.gmra.mrb[2].mxu0 %vm382_vm0, %v6282_v21 }
  0x99   : > { %5466 = vmatprep.mubr.msk.f32.mxu0 %vm382_vm0, %v6294_v24 }
  0x9a   : > { %5279 = vmatmul.mubr.msk.f32.vlgmr.msra.gmra.mrb[0].mxu1 %vm382_vm0, %v6127_v47  ;;  %v1665_v47 = vld [vmem:[%s5945_s6] sm:$0xff] }
  0x9b   : > { %5291 = vmatpush3.msra.mxu1 %v1673_v2  ;;  %5281 = vmatprep.mubr.msk.f32.mxu1 %vm382_vm0, %v6133_v49  ;;  %v3867_v49 = vld [vmem:[%s6723_s3 + $0xc0] sm:$0xff] }
  0x9c   : > { %5304 = vmatprep.subr.mxu1 %v1819_v17  ;;  %5467 = vmatmul.mubr.msk.f32.gmra.mrb[4].mxu0 %vm382_vm0, %v6299_v27 }
  0x9d   : > { %5469 = vmatprep.mubr.msk.f32.mxu0 %vm382_vm0, %v6308_v32 }
  0x9e   : > { %5282 = vmatmul.mubr.msk.f32.gmra.mrb[2].mxu1 %vm382_vm0, %v6145_v51  ;;  %v6494_v51 = vld [vmem:[%s5945_s6 + $0x10] sm:$0xff] }
  0x9f   : > { %5284 = vmatprep.mubr.msk.f32.mxu1 %vm382_vm0, %v6148_v52  ;;  %v1965_v52 = vld [vmem:[%s6723_s3 + $0x58] sm:$0xff] }
  0xa0   : > { %5470 = vmatmul.mubr.msk.f32.gmra.mrb[6].mxu0 %vm382_vm0, %v6470_v19 }
  0xa1   : > { %5474 = vmatprep.mubr.msk.f32.mxu0 %vm382_vm0, %v6319_v40 }
  0xa2   : > { %5285 = vmatmul.mubr.msk.f32.gmra.mrb[4].mxu1 %vm382_vm0, %v6158_v53  ;;  %v6514_v53 = vld [vmem:[%s6240_s16 + $0x81] sm:$0xff] }
  0xa3   : > { %5287 = vmatprep.mubr.msk.f32.mxu1 %vm382_vm0, %v6324_v42 }
  0xa4   : > { %5475 = vmatmul.mubr.msk.f32.vlgmr.msra.gmra.mrb[0].mxu0 %vm382_vm0, %v6327_v45 }
  0xa5   : > { %5487 = vmatpush3.msra.mxu0 %v3720_v15  ;;  %5477 = vmatprep.mubr.msk.f32.mxu0 %vm382_vm0, %v6337_v54 }
  0xa6   : > { %5288 = vmatmul.mubr.msk.f32.gmra.mrb[6].mxu1 %vm382_vm0, %v4670_v44  ;;  %5500 = vmatprep.subr.mxu0 %v3867_v49 }
  0xa7   : > { %5292 = vmatprep.mubr.msk.f32.mxu1 %vm382_vm0, %v1665_v47 }
  0xa8   : > { %5478 = vmatmul.mubr.msk.f32.gmra.mrb[2].mxu0 %vm382_vm0, %v6344_v57 }
  0xa9   : > { %5480 = vmatprep.mubr.msk.f32.mxu0 %vm382_vm0, %v6356_v62 }
  0xaa   : > { %5293 = vmatmul.mubr.msk.f32.vlgmr.msra.gmra.mrb[0].mxu1 %vm382_vm0, %v6494_v51 }
  0xab   : > { %5305 = vmatpush3.msra.mxu1 %v1819_v17  ;;  %5295 = vmatprep.mubr.msk.f32.mxu1 %vm382_vm0, %v6067_v34 }
  0xac   : > { %5318 = vmatprep.subr.mxu1 %v1965_v52  ;;  %5481 = vmatmul.mubr.msk.f32.gmra.mrb[4].mxu0 %vm382_vm0, %v6361_v26 }
  0xad   : > { %5483 = vmatprep.mubr.msk.f32.mxu0 %vm382_vm0, %v6370_v29 }
  0xae   : > { %5296 = vmatmul.mubr.msk.f32.gmra.mrb[2].mxu1 %vm382_vm0, %v6079_v36 }
  0xaf   : > { %5298 = vmatprep.mubr.msk.f32.mxu1 %vm382_vm0, %v6087_v38 }
  0xb0   : > { %5484 = vmatmul.mubr.msk.f32.gmra.mrb[6].mxu0 %vm382_vm0, %v6514_v53 }
  0xb1   : > { %5488 = vmatprep.mubr.msk.f32.mxu0 %vm382_vm0, %v6381_v33 }
  0xb2   : > { %5299 = vmatmul.mubr.msk.f32.gmra.mrb[4].mxu1 %vm382_vm0, %v6098_v41 }
  0xb3   : > { %5301 = vmatprep.mubr.msk.f32.mxu1 %vm382_vm0, %v6107_v43 }
  0xb4   : > { %5489 = vmatmul.mubr.msk.f32.vlgmr.msra.gmra.mrb[0].mxu0 %vm382_vm0, %v6387_v0 }
  0xb5   : > { %5501 = vmatpush3.msra.mxu0 %v3867_v49  ;;  %5491 = vmatprep.mubr.msk.f32.mxu0 %vm382_vm0, %v6396_v37 }
  0xb6   : > { %5302 = vmatmul.mubr.msk.f32.gmra.mrb[6].mxu1 %vm382_vm0, %v6122_v46  ;;  %5514 = vmatprep.subr.mxu0 %v4013_v4 }
  0xb7   : > { %5306 = vmatprep.mubr.msk.f32.mxu1 %vm382_vm0, %v1811_v3 }
  0xb8   : > { %5492 = vmatmul.mubr.msk.f32.gmra.mrb[2].mxu0 %vm382_vm0, %v6403_v61 }
  0xb9   : > { %5494 = vmatprep.mubr.msk.f32.mxu0 %vm382_vm0, %v6415_v7 }
  0xba   : > { %5307 = vmatmul.mubr.msk.f32.vlgmr.msra.gmra.mrb[0].mxu1 %vm382_vm0, %v5948_v8  ;;  %v1957_v8 = vld [vmem:[%s5945_s6 + $0x2] sm:$0xff]  ;;  %s4554_s6 = sshll.u32 %s6743_s18, 3 }
  0xbb   : > { %5319 = vmatpush3.msra.mxu1 %v1965_v52  ;;  %5309 = vmatprep.mubr.msk.f32.mxu1 %vm382_vm0, %v5951_v9  ;;  %v4159_v9 = vld [vmem:[%s6723_s3 + $0xd0] sm:$0xff]  ;;  %s353_s13 = sadd.s32 %s4555_s12, %s4554_s6 }
  0xbc   : > { %5332 = vmatprep.subr.mxu1 %v2112_v22  ;;  %5495 = vmatmul.mubr.msk.f32.gmra.mrb[4].mxu0 %vm382_vm0, %v6420_v6  ;;  %s4556_s14 = sshll.u32 %s353_s13, 3 }
  0xbd   : > { %5497 = vmatprep.mubr.msk.f32.mxu0 %vm382_vm0, %v6429_v10  ;;  %s6665_s25 = scalar_lea.vmem %s6724_s4, %s4556_s14 }
  0xbe   : > { %5310 = vmatmul.mubr.msk.f32.gmra.mrb[2].mxu1 %vm382_vm0, %v5961_v11  ;;  %v4878_v11 = vld [vmem:[%s6240_s16 + $0x90] sm:$0xff] }
  0xbf   : > { %5312 = vmatprep.mubr.msk.f32.mxu1 %vm382_vm0, %v5974_v14  ;;  %v4894_v14 = vld [vmem:[%s6240_s16 + $0x91] sm:$0xff] }
  0xc0   : > { %5498 = vmatmul.mubr.msk.f32.gmra.mrb[6].mxu0 %vm382_vm0, %v4862_v39 }
  0xc1   : > { %5502 = vmatprep.mubr.msk.f32.mxu0 %vm382_vm0, %v6265_v5 }
  0xc2   : > { %5313 = vmatmul.mubr.msk.f32.gmra.mrb[4].mxu1 %vm382_vm0, %v6168_v55 }
  0xc3   : > { %5315 = vmatprep.mubr.msk.f32.mxu1 %vm382_vm0, %v6175_v56 }
  0xc4   : > { %5503 = vmatmul.mubr.msk.f32.vlgmr.msra.gmra.mrb[0].mxu0 %vm382_vm0, %v6275_v13 }
  0xc5   : > { %5515 = vmatpush3.msra.mxu0 %v4013_v4  ;;  %5505 = vmatprep.mubr.msk.f32.mxu0 %vm382_vm0, %v6282_v21 }
  0xc6   : > { %5316 = vmatmul.mubr.msk.f32.gmra.mrb[6].mxu1 %vm382_vm0, %v6188_v58  ;;  %5528 = vmatprep.subr.mxu0 %v4159_v9 }
  0xc7   : > { %5320 = vmatprep.mubr.msk.f32.mxu1 %vm382_vm0, %v1957_v8 }
  0xc8   : > { %5506 = vmatmul.mubr.msk.f32.gmra.mrb[2].mxu0 %vm382_vm0, %v6294_v24 }
  0xc9   : > { %5508 = vmatprep.mubr.msk.f32.mxu0 %vm382_vm0, %v6299_v27 }
  0xca   : > { %5321 = vmatmul.mubr.msk.f32.vlgmr.msra.gmra.mrb[0].mxu1 %vm382_vm0, %v5984_v16 }
  0xcb   : > { %5333 = vmatpush3.msra.mxu1 %v2112_v22  ;;  %5323 = vmatprep.mubr.msk.f32.mxu1 %vm382_vm0, %v5996_v18 }
  0xcc   : > { %5542 = vmatprep.subr.mxu1 %v5904_v1  ;;  %5509 = vmatmul.mubr.msk.f32.gmra.mrb[4].mxu0 %vm382_vm0, %v6308_v32 }
  0xcd   : > { %5511 = vmatprep.mubr.msk.f32.mxu0 %vm382_vm0, %v6470_v19 }
  0xce   : > { %5324 = vmatmul.mubr.msk.f32.gmra.mrb[2].mxu1 %vm382_vm0, %v6004_v20 }
  0xcf   : > { %5326 = vmatprep.mubr.msk.f32.mxu1 %vm382_vm0, %v6015_v23 }
  0xd0   : > { %5512 = vmatmul.mubr.msk.f32.gmra.mrb[6].mxu0 %vm382_vm0, %v4878_v11 }
  0xd1   : > { %5516 = vmatprep.mubr.msk.f32.mxu0 %vm382_vm0, %v6327_v45 }
  0xd2   : > { %5327 = vmatmul.mubr.msk.f32.gmra.mrb[4].mxu1 %vm382_vm0, %v6024_v25 }
  0xd3   : > { %5329 = vmatprep.mubr.msk.f32.mxu1 %vm382_vm0, %v6039_v28 }
  0xd4   : > { %5517 = vmatmul.mubr.msk.f32.vlgmr.msra.gmra.mrb[0].mxu0 %vm382_vm0, %v6337_v54 }
  0xd5   : > { %5529 = vmatpush3.msra.mxu0 %v4159_v9  ;;  %5519 = vmatprep.mubr.msk.f32.mxu0 %vm382_vm0, %v6344_v57 }
  0xd6   : > { %5330 = vmatmul.mubr.msk.f32.gmra.mrb[6].mxu1 %vm382_vm0, %v6047_v30 }
  0xd7   : > { %5334 = vmatprep.mubr.msk.f32.mxu1 %vm382_vm0, %v6494_v51 }
  0xd8   : > { %5520 = vmatmul.mubr.msk.f32.gmra.mrb[2].mxu0 %vm382_vm0, %v6356_v62 }
  0xd9   : > { %5522 = vmatprep.mubr.msk.f32.mxu0 %vm382_vm0, %v6361_v26 }
  0xda   : > { %5335 = vmatmul.mubr.msk.f32.vlgmr.msra.gmra.mrb[0].mxu1 %vm382_vm0, %v6067_v34 }
  0xdb   : > { %5543 = vmatpush3.msra.mxu1 %v5904_v1  ;;  %5337 = vmatprep.mubr.msk.f32.mxu1 %vm382_vm0, %v6079_v36  ;;  %v4910_v1 = vld [vmem:[%s6240_s16 + $0x92] sm:$0xff]  ;;  %s4557_s16 = sshll.u32 %s6737_s19, 3 }
  0xdc   : > { %5523 = vmatmul.mubr.msk.f32.gmra.mrb[4].mxu0 %vm382_vm0, %v6370_v29  ;;  %s361_s26 = sadd.s32 %s4557_s16, %s6743_s18 }
  0xdd   : > { %5525 = vmatprep.mubr.msk.f32.mxu0 %vm382_vm0, %v6514_v53  ;;  %s4558_s27 = sshll.u32 %s361_s26, 3 }
  0xde   : > { %5338 = vmatmul.mubr.msk.f32.gmra.mrb[2].mxu1 %vm382_vm0, %v6087_v38  ;;  %s363_s29 = scalar_lea.vmem %s6725_s5, %s4558_s27 }
  0xdf   : > { %5340 = vmatprep.mubr.msk.f32.mxu1 %vm382_vm0, %v6098_v41 }
  0xe0   : > { %5526 = vmatmul.mubr.msk.f32.gmra.mrb[6].mxu0 %vm382_vm0, %v4894_v14 }
  0xe1   : > { %5530 = vmatprep.mubr.msk.f32.mxu0 %vm382_vm0, %v6387_v0 }
  0xe2   : > { %5341 = vmatmul.mubr.msk.f32.gmra.mrb[4].mxu1 %vm382_vm0, %v6107_v43 }
  0xe3   : > { %5343 = vmatprep.mubr.msk.f32.mxu1 %vm382_vm0, %v6122_v46 }
  0xe4   : > { %5531 = vmatmul.mubr.msk.f32.vlgmr.msra.gmra.mrb[0].mxu0 %vm382_vm0, %v6396_v37 }
  0xe5   : > { %5533 = vmatprep.mubr.msk.f32.mxu0 %vm382_vm0, %v6403_v61 }
  0xe6   : > { %5344 = vmatmul.mubr.msk.f32.gmra.mrb[6].mxu1 %vm382_vm0, %v6130_v48 }
  0xe7   : > { %5354 = vmatprep.mubr.msk.f32.mxu1 %vm382_vm0, %v6168_v55 }
  0xe8   : > { %5534 = vmatmul.mubr.msk.f32.gmra.mrb[2].mxu0 %vm382_vm0, %v6415_v7 }
  0xe9   : > { %5536 = vmatprep.mubr.msk.f32.mxu0 %vm382_vm0, %v6420_v6 }
  0xea   : > { %5355 = vmatmul.mubr.msk.f32.vlgmr.msra.gmra.mrb[4].mxu1 %vm382_vm0, %v6175_v56 }
  0xeb   : > { %5357 = vmatprep.mubr.msk.f32.mxu1 %vm382_vm0, %v6188_v58 }
  0xec   : > { %5537 = vmatmul.mubr.msk.f32.gmra.mrb[4].mxu0 %vm382_vm0, %v6429_v10 }
  0xed   : > { %5539 = vmatprep.mubr.msk.f32.mxu0 %vm382_vm0, %v4862_v39 }
  0xee   : > { %5358 = vmatmul.mubr.msk.f32.gmra.mrb[6].mxu1 %vm382_vm0, %v6193_v59 }
  0xf0   : > { %5540 = vmatmul.mubr.msk.f32.gmra.mrb[6].mxu0 %vm382_vm0, %v4910_v1 }
 0x1ad   : > { %v5336_v16 = vpop.f32.mrb[0].mxu1 }
 0x1ae   : > { %v2203_v18 = vpop.f32.mrb[1].mxu1 }
 0x1b1   : > { %v5339_v20 = vpop.f32.mrb[2].mxu1 }
 0x1b2   : > { %v2213_v23 = vpop.f32.mrb[3].mxu1 }
 0x1b7   : > { %v5532_v25 = vpop.f32.mrb[0].mxu0 }
 0x1b8   : > { %v5544_v28 = vadd.f32 %v5532_v25, %v5336_v16  ;;  %v4250_v30 = vpop.f32.mrb[1].mxu0 }
 0x1b9   : > { %v5545_v34 = vadd.f32 %v4250_v30, %v2203_v18  ;;  %v4355_v18 = vlaneseq }
 0x1ba   : > { %4298 = vst.msk [vmem:[%s6665_s25 + $0x8] sm:$0xff] %vm382_vm0, %v5544_v28  ;;  %v4306_v36 = vsel %vm382_vm0, %v5544_v28, 0.0  ;;  %v4327_v38 = vmul.f32 %v5544_v28, %v5544_v28 }
 0x1bb   : > { %4297 = vst.msk [vmem:[%s6665_s25] sm:$0xff] %vm382_vm0, %v5545_v34  ;;  %v4305_v41 = vsel %vm382_vm0, %v5545_v34, 0.0  ;;  %v4326_v43 = vmul.f32 %v5545_v34, %v5545_v34  ;;  %v5535_v46 = vpop.f32.mrb[2].mxu0  ;;  %v4356_v30 = vshrl.u32 %v4355_v18, 7 }
 0x1bc   : > { %v4335_v48 = vsel %vm382_vm0, %v4327_v38, 0.0  ;;  %v4307_v55 = vadd.f32 %v4306_v36, %v4305_v41  ;;  %v5546_v56 = vadd.f32 %v5535_v46, %v5339_v20  ;;  %v4260_v58 = vpop.f32.mrb[3].mxu0 }
 0x1bd   : > { %v5356_v59 = vpop.f32.mrb[4].mxu1  ;;  %v4334_v5 = vsel %vm382_vm0, %v4326_v43, 0.0  ;;  %v5547_v13 = vadd.f32 %v4260_v58, %v2213_v23  ;;  %vm4358_vm1 = vcmp.eq.s32.totalorder %v4356_v30, 1  ;;  %vm4357_vm2 = vcmp.eq.s32.totalorder %v4356_v30, 0 }
 0x1be   : > { %v2369_v21 = vpop.f32.mrb[5].mxu1  ;;  %v4336_v24 = vadd.f32 %v4335_v48, %v4334_v5  ;;  %4300 = vst.msk [vmem:[%s6665_s25 + $0x18] sm:$0xff] %vm382_vm0, %v5546_v56  ;;  %v4329_v27 = vmul.f32 %v5546_v56, %v5546_v56  ;;  %v4310_v60 = vsel %vm382_vm0, %v5546_v56, 0.0 }
 0x1bf   : > { %4299 = vst.msk [vmem:[%s6665_s25 + $0x10] sm:$0xff] %vm382_vm0, %v5547_v13  ;;  %v4308_v32 = vsel %vm382_vm0, %v5547_v13, 0.0  ;;  %v4328_v40 = vmul.f32 %v5547_v13, %v5547_v13  ;;  %v5538_v42 = vpop.f32.mrb[4].mxu0 }
 0x1c0   : > { %v4309_v45 = vadd.f32 %v4308_v32, %v4307_v55  ;;  %v5548_v50 = vadd.f32 %v5538_v42, %v5356_v59  ;;  %v4270_v54 = vpop.f32.mrb[5].mxu0  ;;  %v4339_v63 = vsel %vm382_vm0, %v4329_v27, 0.0 }
 0x1c1   : > { %v5359_v57 = vpop.f32.mrb[6].mxu1  ;;  %v4337_v62 = vsel %vm382_vm0, %v4328_v40, 0.0  ;;  %v5549_v26 = vadd.f32 %v4270_v54, %v2369_v21 }
 0x1c2   : > { %v2379_v29 = vpop.f32.mrb[7].mxu1  ;;  %v4338_v31 = vadd.f32 %v4337_v62, %v4336_v24  ;;  %4302 = vst.msk [vmem:[%s6665_s25 + $0x28] sm:$0xff] %vm382_vm0, %v5548_v50  ;;  %v4311_v33 = vadd.f32 %v4310_v60, %v4309_v45  ;;  %v4331_v0 = vmul.f32 %v5548_v50, %v5548_v50  ;;  %v4314_v12 = vsel %vm382_vm0, %v5548_v50, 0.0 }
 0x1c3   : > { %4301 = vst.msk [vmem:[%s6665_s25 + $0x20] sm:$0xff] %vm382_vm0, %v5549_v26  ;;  %v4312_v35 = vsel %vm382_vm0, %v5549_v26, 0.0  ;;  %v4330_v37 = vmul.f32 %v5549_v26, %v5549_v26  ;;  %v5541_v61 = vpop.f32.mrb[6].mxu0 }
 0x1c4   : > { %v4313_v2 = vadd.f32 %v4312_v35, %v4311_v33  ;;  %v4340_v7 = vadd.f32 %v4339_v63, %v4338_v31  ;;  %v5550_v6 = vadd.f32 %v5541_v61, %v5359_v57  ;;  %v4280_v10 = vpop.f32.mrb[7].mxu0  ;;  %v4343_v47 = vsel %vm382_vm0, %v4331_v0, 0.0 }
 0x1c5   : > { %v4341_v15 = vsel %vm382_vm0, %v4330_v37, 0.0  ;;  %v5551_v17 = vadd.f32 %v4280_v10, %v2379_v29 }
 0x1c6   : > { %v4342_v19 = vadd.f32 %v4341_v15, %v4340_v7  ;;  %4304 = vst.msk [vmem:[%s6665_s25 + $0x38] sm:$0xff] %vm382_vm0, %v5550_v6  ;;  %v4315_v44 = vadd.f32 %v4314_v12, %v4313_v2  ;;  %v4333_v49 = vmul.f32 %v5550_v6, %v5550_v6  ;;  %v4318_v4 = vsel %vm382_vm0, %v5550_v6, 0.0 }
 0x1c7   : > { %4303 = vst.msk [vmem:[%s6665_s25 + $0x30] sm:$0xff] %vm382_vm0, %v5551_v17  ;;  %v4316_v51 = vsel %vm382_vm0, %v5551_v17, 0.0  ;;  %v4332_v52 = vmul.f32 %v5551_v17, %v5551_v17 }
 0x1c8   : > { %v4317_v53 = vadd.f32 %v4316_v51, %v4315_v44  ;;  %v4344_v3 = vadd.f32 %v4343_v47, %v4342_v19  ;;  %v4347_v9 = vsel %vm382_vm0, %v4333_v49, 0.0 }
 0x1c9   : > { %v4345_v22 = vsel %vm382_vm0, %v4332_v52, 0.0 }
 0x1ca   : > { %v4319_v39 = vadd.f32 %v4318_v4, %v4317_v53  ;;  %v4346_v8 = vadd.f32 %v4345_v22, %v4344_v3 }
 0x1cc   : > { %v4320_v11 = vrot.slane %v4319_v39, 4  ;;  %v4348_v14 = vadd.f32 %v4347_v9, %v4346_v8 }
 0x1ce   : > { %v4321_v1 = vadd.f32 %v4320_v11, %v4319_v39  ;;  %v4349_v16 = vrot.slane %v4348_v14, 4 }
 0x1d0   : > { %v4322_v20 = vrot.slane %v4321_v1, 2  ;;  %v4350_v23 = vadd.f32 %v4349_v16, %v4348_v14 }
 0x1d2   : > { %v4323_v25 = vadd.f32 %v4322_v20, %v4321_v1  ;;  %v4351_v28 = vrot.slane %v4350_v23, 2 }
 0x1d4   : > { %v4352_v34 = vadd.f32 %v4351_v28, %v4350_v23  ;;  %v4324_v36 = vrot.slane %v4323_v25, 1 }
 0x1d6   : > { %v4353_v38 = vrot.slane %v4352_v34, 1  ;;  %v4325_v43 = vadd.f32 %v4324_v36, %v4323_v25 }
 0x1d8   : > { %v4354_v41 = vadd.f32 %v4353_v38, %v4352_v34 }
 0x1da   : > { %v4359_v46 = vsel %vm4358_vm1, %v4354_v41, 0.0 }
 0x1db   : > { %v4360_v48 = vsel %vm4357_vm2, %v4325_v43, %v4359_v46 }
 0x1dc   : > { %4361 = vst.msk [vmem:[%s363_s29] sm:$0xff] %vm382_vm0, %v4360_v48 }
 0x1dd PF: > { %s16_s22 = sadd.s32 1, %s5834_s22   ;;  %s6726_s18 = smov %s5826_s20 }
 0x1de   : > { %p13_p10 = scmp.ge.s32.totalorder %s16_s22, 18   ;;  %s6727_s19 = smov %s5830_s21 }
 0x1df   : > { %s6728_s20 = smov %s6731_s23  ;;  %s6729_s21 = smov %s6735_s24 }
 0x1e0   :  { %15 = sbr.rel (!%p13_p10) target bundleno = 3 (0x3), region = 90 }

// kernel: resnext_basic_block.7
= control target key start
LH: loop header
LB: loop body
LE: loop exit
PB: predicated region body
PF: predicated region fallthrough
CT: control target
= control target key end

     0   :  { %s542_s12 = smov 0   ;;  %s544_s13 = smov 0   ;;  %s625_s0 = inlined_call_operand.vmem [shape: f32[2,8,64,8], index: 0, kind: input, shape index: {}]   ;;  %s626_s1 = inlined_call_operand.vmem [shape: f32[8,8], index: 1, kind: input, shape index: {}]   ;;  %s627_s2 = inlined_call_operand.vmem [shape: f32[2,8,64,8], index: 2, kind: input, shape index: {}]   ;;  %s628_s3 = inlined_call_operand.vmem [shape: f32[2,8,64,8], index: 3, kind: output, shape index: {}]  }
   0x1   :  { %s546_s14 = smov 0   ;;  %s548_s15 = smov 0  }
   0x2   :  { %s550_s16 = smov 0  }
   0x3 LB: > { %s22_s17 = sadd.s32 1, %s512_s14  ;;  %s25_s18 = sadd.s32 1, %s516_s15  ;;  %s520_s16 = sphi %s550_s16, %s13_s16   ;;  %s516_s15 = sphi %s548_s15, %s632_s15   ;;  %s512_s14 = sphi %s546_s14, %s631_s14   ;;  %s508_s13 = sphi %s544_s13, %s630_s13   ;;  %s504_s12 = sphi %s542_s12, %s629_s12  }
   0x4   : > { %p23_p0 = scmp.ge.s32.totalorder %s22_s17, 8  ;;  %p428_p1 = scmp.ge.s32.totalorder %s520_s16, 1 }
   0x5   : > { %p173_p2 = scmp.lt.s32.totalorder %s520_s16, 17 }
   0x6   : > { %s634_s17 = smov (%p23_p0, %s22_s17), 0  ;;  %s636_s18 = smov (!%p23_p0, %s25_s18), %s516_s15 }
   0x7   : > { %p174_p3 = pnand %p428_p1, %p173_p2  ;;  %p27_p4 = scmp.ge.s32.totalorder %s636_s18, 2 }
   0x8   : > { %p214_p5 = scmp.lt.s32.totalorder (!%p174_p3), %s508_s13, 1  ;;  %p216_p6 = scmp.lt.s32.totalorder (!%p174_p3), %s504_s12, 7  ;;  %v438_v0 = vld [vmem:[%s626_s1] ss:$0 sm:$0xff] (!%p174_p3)  ;;  %v439_v1 = vld [vmem:[%s626_s1 + $0x1] ss:$0 sm:$0xff] (!%p174_p3) }
   0x9   : > { %s638_s18 = smov (%p27_p4, %s636_s18), 0  ;;  %177 = sbr.rel (%p174_p3) target bundleno = 36 (0x24), region = 32 }
   0xa   : > { %vm299_vm0 = vcmask (!%p174_p3), 64512  }
  0x10   : > { %s640_s13 = smov (!%p214_p5, %s508_s13), 1  ;;  %s642_s12 = smov (!%p216_p6, %s504_s12), 7 }
  0x11   : > { %s430_s19 = sshll.u32 %s640_s13, 6  ;;  %s429_s20 = sshll.u32 %s642_s12, 3 }
  0x12   : > { %s220_s21 = sadd.s32 %s430_s19, %s429_s20 }
  0x13   : > { %s572_s22 = sshll.u32 %s220_s21, 3 }
  0x14   : > { %s222_s27 = scalar_lea.vmem %s625_s0, %s572_s22  ;;  %s585_s30 = scalar_lea.vmem %s627_s2, %s572_s22 }
  0x15   : > { %v243_v2 = vld [vmem:[%s222_s27] sm:$0xff]  ;;  %v244_v3 = vld [vmem:[%s222_s27 + $0x8] sm:$0xff]  ;;  %v245_v7 = vld [vmem:[%s222_s27 + $0x10] sm:$0xff]  ;;  %s240_s8 = scalar_lea.vmem %s628_s3, %s572_s22 }
  0x16   : > { %v251_v4 = vld [vmem:[%s585_s30] sm:$0xff]  ;;  %v263_v5 = vmul.f32 %v438_v0, %v243_v2  ;;  %v264_v6 = vmul.f32 %v438_v0, %v244_v3  ;;  %v252_v8 = vld [vmem:[%s585_s30 + $0x8] sm:$0xff]  ;;  %v265_v9 = vmul.f32 %v438_v0, %v245_v7  ;;  %v246_v10 = vld [vmem:[%s222_s27 + $0x18] sm:$0xff] }
  0x17   : > { %v247_v11 = vld [vmem:[%s222_s27 + $0x20] sm:$0xff]  ;;  %v253_v14 = vld [vmem:[%s585_s30 + $0x10] sm:$0xff]  ;;  %v254_v15 = vld [vmem:[%s585_s30 + $0x18] sm:$0xff]  ;;  %v266_v16 = vmul.f32 %v438_v0, %v246_v10 }
  0x18   : > { %v275_v12 = vadd.f32 %v439_v1, %v263_v5  ;;  %v276_v13 = vadd.f32 %v439_v1, %v264_v6  ;;  %v267_v17 = vmul.f32 %v438_v0, %v247_v11  ;;  %v248_v18 = vld [vmem:[%s222_s27 + $0x28] sm:$0xff]  ;;  %v277_v19 = vadd.f32 %v439_v1, %v265_v9  ;;  %v255_v20 = vld [vmem:[%s585_s30 + $0x20] sm:$0xff]  ;;  %v249_v22 = vld [vmem:[%s222_s27 + $0x30] sm:$0xff] }
  0x19   : > { %v268_v21 = vmul.f32 %v438_v0, %v248_v18  ;;  %v250_v23 = vld [vmem:[%s222_s27 + $0x38] sm:$0xff]  ;;  %v278_v26 = vadd.f32 %v439_v1, %v266_v16  ;;  %v256_v28 = vld [vmem:[%s585_s30 + $0x28] sm:$0xff]  ;;  %v269_v31 = vmul.f32 %v438_v0, %v249_v22  ;;  %v257_v37 = vld [vmem:[%s585_s30 + $0x30] sm:$0xff] }
  0x1a   : > { %v283_v24 = vadd.f32 %v275_v12, %v251_v4  ;;  %v284_v25 = vadd.f32 %v276_v13, %v252_v8  ;;  %v279_v27 = vadd.f32 %v439_v1, %v267_v17  ;;  %v285_v29 = vadd.f32 %v277_v19, %v253_v14  ;;  %v258_v38 = vld [vmem:[%s585_s30 + $0x38] sm:$0xff] }
  0x1b   : > { %v280_v30 = vadd.f32 %v439_v1, %v268_v21  ;;  %v270_v32 = vmul.f32 %v438_v0, %v250_v23  ;;  %v286_v35 = vadd.f32 %v278_v26, %v254_v15  ;;  %v281_v41 = vadd.f32 %v439_v1, %v269_v31 }
  0x1c   : > { %v291_v33 = vmax.f32 %v283_v24, 0.0  ;;  %v292_v34 = vmax.f32 %v284_v25, 0.0  ;;  %v287_v36 = vadd.f32 %v279_v27, %v255_v20  ;;  %v293_v39 = vmax.f32 %v285_v29, 0.0 }
  0x1d   : > { %v288_v40 = vadd.f32 %v280_v30, %v256_v28  ;;  %v282_v42 = vadd.f32 %v439_v1, %v270_v32  ;;  %v294_v43 = vmax.f32 %v286_v35, 0.0  ;;  %v289_v46 = vadd.f32 %v281_v41, %v257_v37 }
  0x1e   : > { %300 = vst.msk [vmem:[%s240_s8] sm:$0xff] %vm299_vm0, %v291_v33  ;;  %301 = vst.msk [vmem:[%s240_s8 + $0x8] sm:$0xff] %vm299_vm0, %v292_v34  ;;  %v295_v44 = vmax.f32 %v287_v36, 0.0 }
  0x1f   : > { %302 = vst.msk [vmem:[%s240_s8 + $0x10] sm:$0xff] %vm299_vm0, %v293_v39  ;;  %v296_v45 = vmax.f32 %v288_v40, 0.0  ;;  %v290_v47 = vadd.f32 %v282_v42, %v258_v38  ;;  %303 = vst.msk [vmem:[%s240_s8 + $0x18] sm:$0xff] %vm299_vm0, %v294_v43  ;;  %v297_v48 = vmax.f32 %v289_v46, 0.0 }
  0x20   : > { %304 = vst.msk [vmem:[%s240_s8 + $0x20] sm:$0xff] %vm299_vm0, %v295_v44 }
  0x21   : > { %305 = vst.msk [vmem:[%s240_s8 + $0x28] sm:$0xff] %vm299_vm0, %v296_v45  ;;  %v298_v49 = vmax.f32 %v290_v47, 0.0  ;;  %306 = vst.msk [vmem:[%s240_s8 + $0x30] sm:$0xff] %vm299_vm0, %v297_v48 }
  0x23   : > { %307 = vst.msk [vmem:[%s240_s8 + $0x38] sm:$0xff] %vm299_vm0, %v298_v49 }
  0x24 PF: > { %s13_s16 = sadd.s32 1, %s520_s16   ;;  %s629_s12 = smov %s512_s14 }
  0x25   : > { %p10_p7 = scmp.ge.s32.totalorder %s13_s16, 18   ;;  %s630_s13 = smov %s516_s15 }
  0x26   : > { %s631_s14 = smov %s634_s17  ;;  %s632_s15 = smov %s638_s18 }
  0x27   :  { %12 = sbr.rel (!%p10_p7) target bundleno = 3 (0x3), region = 65 }

</bundles_post_ra>
